<compile_context>
chip_gen: v7x
topology: tpu7x:2x2x1
jax: 0.10.0
libtpu: 0.0.40
codegen_flags: <defaults>
</compile_context>

<pallas_src>
import functools

import jax
import jax.numpy as jnp
from jax.experimental import pallas as pl
from jax.experimental.pallas import tpu as pltpu

LANES = 128          # lane width: feature dims padded to multiples of this
BLOCK_M = 512        # rows per grid step (review: 512-1024 instead of 128)
MXU_DTYPE = jnp.bfloat16


# ----------------------------------------------------------------------------
# small helpers
# ----------------------------------------------------------------------------
def _round_up(x, m):
    return ((x + m - 1) // m) * m


def _pad2d(w, rows, cols, dtype=MXU_DTYPE):
    w = jnp.pad(w, ((0, rows - w.shape[0]), (0, cols - w.shape[1])))
    return w.astype(dtype)


def _pad_bias(b, cols):
    return jnp.pad(b, (0, cols - b.shape[0])).reshape(1, cols).astype(jnp.float32)


def _pad_rows_features(x, cols):
    # zero-pad feature (lane) axis and cast for the MXU
    return jnp.pad(x, ((0, 0), (0, cols - x.shape[1]))).astype(MXU_DTYPE)


def _silu(x):
    return x * jax.nn.sigmoid(x)


# ----------------------------------------------------------------------------
# Pallas kernels (all row-wise, everything padded to 128-lane multiples)
# ----------------------------------------------------------------------------
def _edge_kernel(x_ref, w1e, b1e, w2e, b2e, w1r, b1r, w2r, ef_ref, sc_ref):
    """edge_mlp (2xSiLU) fused with coord_mlp_r (hidden SiLU, linear head)."""
    x = x_ref[...]
    h = _silu(jnp.dot(x, w1e[...], preferred_element_type=jnp.float32) + b1e[...])
    ef = _silu(jnp.dot(h.astype(MXU_DTYPE), w2e[...],
                       preferred_element_type=jnp.float32) + b2e[...])
    ef_ref[...] = ef
    hr = _silu(jnp.dot(ef.astype(MXU_DTYPE), w1r[...],
                       preferred_element_type=jnp.float32) + b1r[...])
    sc_ref[...] = jnp.dot(hr.astype(MXU_DTYPE), w2r[...],
                          preferred_element_type=jnp.float32)


def _vedge_kernel(x_ref, w1, b1, w2, b2, w1s, b1s, w2s, vef_ref, sc_ref):
    """edge_mlp_virtual fused with stacked coord_mlp_{r,v}_virtual heads."""
    x = x_ref[...]
    h = _silu(jnp.dot(x, w1[...], preferred_element_type=jnp.float32) + b1[...])
    vef = _silu(jnp.dot(h.astype(MXU_DTYPE), w2[...],
                        preferred_element_type=jnp.float32) + b2[...])
    vef_ref[...] = vef
    hs = _silu(jnp.dot(vef.astype(MXU_DTYPE), w1s[...],
                       preferred_element_type=jnp.float32) + b1s[...])
    # column 0 = coord_mlp_r_virtual, column 1 = coord_mlp_v_virtual
    sc_ref[...] = jnp.dot(hs.astype(MXU_DTYPE), w2s[...],
                          preferred_element_type=jnp.float32)


def _node_kernel(x_ref, w1n, b1n, w2n, b2n, w1v, b1v, w2v, b2v, nout_ref, vs_ref):
    """node_mlp fused with coord_mlp_vel (vel reads node_feat cols of node_in)."""
    x = x_ref[...]
    h = _silu(jnp.dot(x, w1n[...], preferred_element_type=jnp.float32) + b1n[...])
    nout_ref[...] = jnp.dot(h.astype(MXU_DTYPE), w2n[...],
                            preferred_element_type=jnp.float32) + b2n[...]
    hv = _silu(jnp.dot(x, w1v[...], preferred_element_type=jnp.float32) + b1v[...])
    vs_ref[...] = jnp.dot(hv.astype(MXU_DTYPE), w2v[...],
                          preferred_element_type=jnp.float32) + b2v[...]


def _vnode_kernel(x_ref, w1, b1, w2, b2, o_ref):
    """node_mlp_virtual (Linear -> SiLU -> Linear)."""
    x = x_ref[...]
    h = _silu(jnp.dot(x, w1[...], preferred_element_type=jnp.float32) + b1[...])
    o_ref[...] = jnp.dot(h.astype(MXU_DTYPE), w2[...],
                         preferred_element_type=jnp.float32) + b2[...]


def _cost_estimate(x, weights, out_widths):
    """Rough per-call cost hint for the XLA scheduler."""
    m = x.shape[0]
    flops, trans = 0, 0
    bytes_accessed = int(x.size) * jnp.dtype(x.dtype).itemsize
    for w in weights:
        bytes_accessed += int(w.size) * jnp.dtype(w.dtype).itemsize
        if w.shape[0] > 1:                       # matmul weight (not a bias row)
            flops += 2 * m * int(w.shape[0]) * int(w.shape[1])
            trans += m * int(w.shape[1])         # ~one sigmoid per hidden col
    bytes_accessed += sum(m * int(d) * 4 for d in out_widths)
    return pl.CostEstimate(flops=int(flops), transcendentals=int(trans),
                           bytes_accessed=int(bytes_accessed))


def _fused_rowwise(kernel, x, weights, out_widths):
    """Run a fused row-wise MLP kernel over x [m, k_padded] -> f32 outputs."""
    m, k = x.shape
    bm = min(BLOCK_M, _round_up(m, 16))          # 16: bf16 sublane packing
    grid = (pl.cdiv(m, bm),)                     # ragged last block masked by Pallas
    in_specs = [pl.BlockSpec((bm, k), lambda i: (i, 0))]
    in_specs += [pl.BlockSpec(w.shape, lambda i: (0, 0)) for w in weights]
    out_shape = tuple(jax.ShapeDtypeStruct((m, d), jnp.float32) for d in out_widths)
    out_specs = tuple(pl.BlockSpec((bm, d), lambda i: (i, 0)) for d in out_widths)
    outs = pl.pallas_call(
        kernel,
        out_shape=out_shape,
        grid=grid,
        in_specs=in_specs,
        out_specs=out_specs,
        compiler_params=pltpu.CompilerParams(dimension_semantics=("parallel",)),
        cost_estimate=_cost_estimate(x, weights, out_widths),
    )(x, *weights)
    return list(outs)


# ----------------------------------------------------------------------------
# JAX glue: segment reductions (torch scatter_add semantics)
# ----------------------------------------------------------------------------
# TODO(synk): data-dependent scatter-add (unsorted_segment_mean /
# global_mean_pool) stays in JAX; a Pallas version would need manual DMA scatter.
def segment_mean(data, seg_ids, num_segments):
    summed = jnp.zeros((num_segments, data.shape[1]), data.dtype).at[seg_ids].add(data)
    counts = jnp.zeros((num_segments,), data.dtype).at[seg_ids].add(1.0)
    return summed / jnp.maximum(counts, 1.0)[:, None]


# ----------------------------------------------------------------------------
# Deterministic parameter init (mirrors the nn.Module __init__ shapes)
# ----------------------------------------------------------------------------
def _linear(key, din, dout):
    kw, kb = jax.random.split(key)
    bound = 1.0 / (din ** 0.5)
    w = jax.random.uniform(kw, (din, dout), jnp.float32, -bound, bound)
    b = jax.random.uniform(kb, (dout,), jnp.float32, -bound, bound)
    return w, b


def _mlp_params(key, din, dh, dout, last_bias=True, last_scale=None):
    k1, k2 = jax.random.split(key)
    w1, b1 = _linear(k1, din, dh)
    w2, b2 = _linear(k2, dh, dout)
    if last_scale is not None:
        w2 = w2 * last_scale        # coord MLP final layer: xavier gain 0.001
    if not last_bias:
        b2 = jnp.zeros_like(b2)     # coord MLP final layer has no bias
    return (w1, b1, w2, b2)


def init_params(key, node_feat_nf, node_feat_out_nf, node_attr_nf,
                edge_attr_nf, hidden_nf, virtual_channels):
    ks = jax.random.split(key, 8)
    edge_in = 2 * node_feat_nf + 1 + edge_attr_nf
    edge_v_in = 2 * node_feat_nf + 1 + virtual_channels
    node_in = hidden_nf + hidden_nf + virtual_channels * hidden_nf + node_attr_nf
    node_v_in = hidden_nf + hidden_nf
    return {
        "edge_mlp": _mlp_params(ks[0], edge_in, hidden_nf, hidden_nf),
        "edge_mlp_virtual": _mlp_params(ks[1], edge_v_in, hidden_nf, hidden_nf),
        "coord_mlp_r": _mlp_params(ks[2], hidden_nf, hidden_nf, 1,
                                   last_bias=False, last_scale=0.001),
        "coord_mlp_r_virtual": _mlp_params(ks[3], hidden_nf, hidden_nf, 1,
                                           last_bias=False, last_scale=0.001),
        "coord_mlp_v_virtual": _mlp_params(ks[4], hidden_nf, hidden_nf, 1,
                                           last_bias=False, last_scale=0.001),
        "coord_mlp_vel": _mlp_params(ks[5], node_feat_nf, hidden_nf, 1),
        "node_mlp": _mlp_params(ks[6], node_in, hidden_nf, node_feat_out_nf),
        "node_mlp_virtual": _mlp_params(ks[7], node_v_in, hidden_nf, node_feat_out_nf),
    }


# ----------------------------------------------------------------------------
# Forward pass (residual=True, attention=False, normalize=False, tanh=False,
# coords_agg='mean', gravity=None)
# ----------------------------------------------------------------------------
def e_gcl_vel_forward(params, node_feat, edge_index, coord, node_vel,
                      virtual_coord, virtual_node_feat, data_batch,
                      edge_attr, node_attr, *, num_graphs):
    N, H = node_feat.shape
    C = virtual_coord.shape[-1]
    row, col = edge_index[0], edge_index[1]

    Hp = _round_up(H, LANES)
    Hout = params["node_mlp"][2].shape[1]
    Hout_p = _round_up(Hout, LANES)
    Kp1 = _round_up(2 * H + 1 + edge_attr.shape[1], LANES)      # edge rows
    Kp2 = _round_up(2 * H + 1 + C, LANES)                       # virtual-edge rows
    Kp3 = _round_up(2 * H + C * H + node_attr.shape[1], LANES)  # node rows
    Kp4 = _round_up(2 * H, LANES)                               # virtual-node rows

    # ---- pad / stack parameters to lane-aligned bf16 slabs (tiny, fused by XLA) ----
    w1e, b1e, w2e, b2e = params["edge_mlp"]
    w1r, b1r, w2r, _ = params["coord_mlp_r"]
    ew = (_pad2d(w1e, Kp1, Hp), _pad_bias(b1e, Hp),
          _pad2d(w2e, Hp, Hp), _pad_bias(b2e, Hp),
          _pad2d(w1r, Hp, Hp), _pad_bias(b1r, Hp),
          _pad2d(w2r, Hp, LANES))

    w1ev, b1ev, w2ev, b2ev = params["edge_mlp_virtual"]
    w1rv, b1rv, w2rv, _ = params["coord_mlp_r_virtual"]
    w1vv, b1vv, w2vv, _ = params["coord_mlp_v_virtual"]
    w1s = jnp.concatenate([_pad2d(w1rv, Hp, Hp), _pad2d(w1vv, Hp, Hp)], axis=1)
    b1s = jnp.concatenate([_pad_bias(b1rv, Hp), _pad_bias(b1vv, Hp)], axis=1)
    w2s = (jnp.zeros((2 * Hp, LANES), jnp.float32)
           .at[:H, 0].set(w2rv[:, 0])
           .at[Hp:Hp + H, 1].set(w2vv[:, 0])).astype(MXU_DTYPE)
    vew = (_pad2d(w1ev, Kp2, Hp), _pad_bias(b1ev, Hp),
           _pad2d(w2ev, Hp, Hp), _pad_bias(b2ev, Hp),
           w1s, b1s, w2s)

    w1n, b1n, w2n, b2n = params["node_mlp"]
    w1vel, b1vel, w2vel, b2vel = params["coord_mlp_vel"]
    # coord_mlp_vel reads node_feat = cols [0, H) of node_in -> embed W1 rows there
    w1vel_emb = (jnp.zeros((Kp3, Hp), jnp.float32)
                 .at[:H, :H].set(w1vel)).astype(MXU_DTYPE)
    nw = (_pad2d(w1n, Kp3, Hp), _pad_bias(b1n, Hp),
          _pad2d(w2n, Hp, Hout_p), _pad_bias(b2n, Hout_p),
          w1vel_emb, _pad_bias(b1vel, Hp),
          _pad2d(w2vel, Hp, LANES), _pad_bias(b2vel, LANES))

    w1vn, b1vn, w2vn, b2vn = params["node_mlp_virtual"]
    vnw = (_pad2d(w1vn, Kp4, Hp), _pad_bias(b1vn, Hp),
           _pad2d(w2vn, Hp, Hout_p), _pad_bias(b2vn, Hout_p))

    # ---- geometry (glue) ----
    coord_diff = coord[row] - coord[col]                                   # [E,3]
    radial = jnp.sum(coord_diff ** 2, axis=1, keepdims=True)               # [E,1]

    virtual_coord_diff = virtual_coord[data_batch] - coord[:, :, None]     # [N,3,C]
    virtual_radial = jnp.sqrt(jnp.sum(virtual_coord_diff ** 2, axis=1))    # [N,C]

    coord_mean = segment_mean(coord, data_batch, num_graphs)               # [B,3]
    m_X = virtual_coord - coord_mean[:, :, None]                           # [B,3,C]
    m_X = jnp.einsum("bij,bjk->bik", jnp.transpose(m_X, (0, 2, 1)), m_X)   # [B,C,C]

    # ---- kernel 1: edges (edge_mlp -> coord_mlp_r) ----
    edge_in = jnp.concatenate([node_feat[row], node_feat[col], radial, edge_attr], axis=1)
    edge_x = _pad_rows_features(edge_in, Kp1)
    ef_p, esc_p = _fused_rowwise(_edge_kernel, edge_x, ew, (Hp, LANES))
    edge_feat = ef_p[:, :H]                                                # [E,H]
    scale_r = esc_p[:, :1]                                                 # [E,1]

    # ---- kernel 2: virtual edges, rows built directly in [N*C, feat] layout ----
    feat_R = jnp.broadcast_to(node_feat[:, None, :], (N, C, H))            # [N,C,H]
    feat_V = jnp.swapaxes(virtual_node_feat, 1, 2)[data_batch]             # [N,C,H]
    mix_V = jnp.swapaxes(m_X, 1, 2)[data_batch]                            # [N,C,C]
    ve_in = jnp.concatenate([feat_R, feat_V, virtual_radial[:, :, None], mix_V],
                            axis=-1).reshape(N * C, -1)
    ve_x = _pad_rows_features(ve_in, Kp2)
    vef_p, vsc_p = _fused_rowwise(_vedge_kernel, ve_x, vew, (Hp, LANES))
    ve_nch = vef_p[:, :H].reshape(N, C, H)                                 # [N,C,H]
    scale_rv = vsc_p[:, 0].reshape(N, C)                                   # [N,C]
    scale_vv = vsc_p[:, 1].reshape(N, C)                                   # [N,C]

    # ---- segment reductions (glue) ----
    agg_e = segment_mean(edge_feat, row, N)                                # [N,H]
    vef_flat = jnp.swapaxes(ve_nch, 1, 2).reshape(N, H * C)                # torch [N,H,C].reshape
    agg_v = segment_mean(ve_nch.reshape(N, C * H), data_batch,
                         num_graphs).reshape(num_graphs, C, H)             # [B,C,H]

    # ---- kernel 3: nodes (node_mlp + coord_mlp_vel) ----
    node_in = jnp.concatenate([node_feat, agg_e, vef_flat, node_attr], axis=1)
    node_x = _pad_rows_features(node_in, Kp3)
    nout_p, vscale_p = _fused_rowwise(_node_kernel, node_x, nw, (Hout_p, LANES))
    node_out = nout_p[:, :Hout]                                            # [N,Hout]
    vel_scale = vscale_p[:, :1]                                            # [N,1]

    # ---- kernel 4: virtual nodes (node_mlp_virtual) ----
    vn_in = jnp.concatenate([jnp.swapaxes(virtual_node_feat, 1, 2), agg_v],
                            axis=-1).reshape(num_graphs * C, 2 * H)
    vn_x = _pad_rows_features(vn_in, Kp4)
    vnout_p = _fused_rowwise(_vnode_kernel, vn_x, vnw, (Hout_p,))[0]
    vn_out = jnp.swapaxes(vnout_p[:, :Hout].reshape(num_graphs, C, Hout), 1, 2)

    # ---- coordinate updates ----
    coord_new = coord + segment_mean(coord_diff * scale_r, row, N)         # coords_agg='mean'
    trans_v = jnp.mean(-virtual_coord_diff * scale_rv[:, None, :], axis=-1)
    coord_new = coord_new + trans_v
    coord_new = coord_new + vel_scale * node_vel
    # gravity is None -> no gravity term

    trans_vc = virtual_coord_diff * scale_vv[:, None, :]                   # [N,3,C]
    agg_vc = segment_mean(trans_vc.reshape(N, 3 * C), data_batch, num_graphs)
    virtual_coord_new = virtual_coord + agg_vc.reshape(num_graphs, 3, C)

    # ---- feature updates (residual) ----
    node_feat_new = node_feat + node_out
    virtual_node_feat_new = virtual_node_feat + vn_out

    return node_feat_new, coord_new, virtual_node_feat_new, virtual_coord_new


# ----------------------------------------------------------------------------
if __name__ == "__main__":
    # Small, module-consistent shapes
    B = 2            # graphs
    N_PER = 10       # nodes per graph
    N = B * N_PER    # total real nodes
    E = 40           # total edges
    H = 32           # node_feat_nf = node_feat_out_nf = hidden_nf (residual)
    C = 4            # virtual channels
    EDGE_ATTR_NF = 1
    NODE_ATTR_NF = 1

    key = jax.random.PRNGKey(0)
    kp, k1, k2, k3, k4, k5, k6, k7, k8 = jax.random.split(key, 9)

    params = init_params(kp, H, H, NODE_ATTR_NF, EDGE_ATTR_NF, H, C)

    node_feat = jax.random.normal(k1, (N, H), jnp.float32)
    coord = jax.random.normal(k2, (N, 3), jnp.float32)
    node_vel = jax.random.normal(k3, (N, 3), jnp.float32)
    virtual_coord = jax.random.normal(k4, (B, 3, C), jnp.float32)
    virtual_node_feat = jax.random.normal(k5, (B, H, C), jnp.float32)
    edge_attr = jax.random.normal(k6, (E, EDGE_ATTR_NF), jnp.float32)
    node_attr = jax.random.normal(k7, (N, NODE_ATTR_NF), jnp.float32)

    data_batch = jnp.repeat(jnp.arange(B, dtype=jnp.int32), N_PER)        # [N]
    # edges within each graph
    erow = jax.random.randint(k8, (E,), 0, N_PER, jnp.int32)
    ecol = jax.random.randint(jax.random.fold_in(k8, 1), (E,), 0, N_PER, jnp.int32)
    graph_of_edge = jnp.repeat(jnp.arange(B, dtype=jnp.int32), E // B)
    edge_index = jnp.stack([erow + graph_of_edge * N_PER,
                            ecol + graph_of_edge * N_PER], axis=0)        # [2,E]

    fwd = jax.jit(functools.partial(e_gcl_vel_forward, num_graphs=B))
    nf, cr, vnf, vc = fwd(params, node_feat, edge_index, coord, node_vel,
                          virtual_coord, virtual_node_feat, data_batch,
                          edge_attr, node_attr)
    jax.block_until_ready((nf, cr, vnf, vc))
    assert nf.shape == (N, H) and cr.shape == (N, 3)
    assert vnf.shape == (B, H, C) and vc.shape == (B, 3, C)
    print("KERNEL_OK")
</pallas_src>

<mosaic_0001>
module attributes {stable_mosaic.version = 11 : i64} {
  func.func @_vedge_kernel(%arg0: i32, %arg1: memref<80x128xbf16, #tpu.memory_space<vmem>>, %arg2: memref<128x128xbf16, #tpu.memory_space<vmem>>, %arg3: memref<1x128xf32, #tpu.memory_space<vmem>>, %arg4: memref<128x128xbf16, #tpu.memory_space<vmem>>, %arg5: memref<1x128xf32, #tpu.memory_space<vmem>>, %arg6: memref<128x256xbf16, #tpu.memory_space<vmem>>, %arg7: memref<1x256xf32, #tpu.memory_space<vmem>>, %arg8: memref<256x128xbf16, #tpu.memory_space<vmem>>, %arg9: memref<80x128xf32, #tpu.memory_space<vmem>>, %arg10: memref<80x128xf32, #tpu.memory_space<vmem>>) attributes {dimension_semantics = [#tpu.dimension_semantics<parallel>], iteration_bounds = array<i64: 1>, scalar_prefetch = 0 : i64, scratch_operands = 0 : i64, tpu.core_type = #tpu.core_type<tc>, window_params = [{transform_indices = @transform_0, window_bounds = array<i64: 80, 128>}, {pipeline_mode = #tpu.pipeline_mode<synchronous>, transform_indices = @transform_1, window_bounds = array<i64: 128, 128>}, {pipeline_mode = #tpu.pipeline_mode<synchronous>, transform_indices = @transform_2, window_bounds = array<i64: 1, 128>}, {pipeline_mode = #tpu.pipeline_mode<synchronous>, transform_indices = @transform_3, window_bounds = array<i64: 128, 128>}, {pipeline_mode = #tpu.pipeline_mode<synchronous>, transform_indices = @transform_4, window_bounds = array<i64: 1, 128>}, {pipeline_mode = #tpu.pipeline_mode<synchronous>, transform_indices = @transform_5, window_bounds = array<i64: 128, 256>}, {pipeline_mode = #tpu.pipeline_mode<synchronous>, transform_indices = @transform_6, window_bounds = array<i64: 1, 256>}, {pipeline_mode = #tpu.pipeline_mode<synchronous>, transform_indices = @transform_7, window_bounds = array<i64: 256, 128>}, {transform_indices = @transform_8, window_bounds = array<i64: 80, 128>}, {transform_indices = @transform_9, window_bounds = array<i64: 80, 128>}]} {
    %c0 = arith.constant 0 : index
    %c0_0 = arith.constant 0 : index
    %0 = vector.load %arg1[%c0, %c0_0] : memref<80x128xbf16, #tpu.memory_space<vmem>>, vector<80x128xbf16>
    %c0_1 = arith.constant 0 : index
    %c0_2 = arith.constant 0 : index
    %1 = vector.load %arg2[%c0_1, %c0_2] : memref<128x128xbf16, #tpu.memory_space<vmem>>, vector<128x128xbf16>
    %cst = arith.constant dense<0.000000e+00> : vector<80x128xf32>
    %2 = tpu.matmul %0, %1, %cst {dimension_numbers = #tpu.dot_dimension_numbers<[1], [0], [0], [1], [0, 0, 1, 1], [], []>} : vector<80x128xbf16>, vector<128x128xbf16>, vector<80x128xf32> -> vector<80x128xf32>
    %c0_3 = arith.constant 0 : index
    %c0_4 = arith.constant 0 : index
    %3 = vector.load %arg3[%c0_3, %c0_4] : memref<1x128xf32, #tpu.memory_space<vmem>>, vector<1x128xf32>
    %4 = vector.broadcast %3 : vector<1x128xf32> to vector<80x128xf32>
    %5 = arith.addf %2, %4 : vector<80x128xf32>
    %6 = arith.negf %5 : vector<80x128xf32>
    %7 = math.exp %6 : vector<80x128xf32>
    %cst_5 = arith.constant 1.000000e+00 : f32
    %8 = vector.broadcast %cst_5 : f32 to vector<80x128xf32>
    %9 = arith.addf %8, %7 : vector<80x128xf32>
    %10 = arith.divf %8, %9 : vector<80x128xf32>
    %11 = arith.mulf %5, %10 : vector<80x128xf32>
    %12 = arith.truncf %11 : vector<80x128xf32> to vector<80x128xbf16>
    %c0_6 = arith.constant 0 : index
    %c0_7 = arith.constant 0 : index
    %13 = vector.load %arg4[%c0_6, %c0_7] : memref<128x128xbf16, #tpu.memory_space<vmem>>, vector<128x128xbf16>
    %cst_8 = arith.constant dense<0.000000e+00> : vector<80x128xf32>
    %14 = tpu.matmul %12, %13, %cst_8 {dimension_numbers = #tpu.dot_dimension_numbers<[1], [0], [0], [1], [0, 0, 1, 1], [], []>} : vector<80x128xbf16>, vector<128x128xbf16>, vector<80x128xf32> -> vector<80x128xf32>
    %c0_9 = arith.constant 0 : index
    %c0_10 = arith.constant 0 : index
    %15 = vector.load %arg5[%c0_9, %c0_10] : memref<1x128xf32, #tpu.memory_space<vmem>>, vector<1x128xf32>
    %16 = vector.broadcast %15 : vector<1x128xf32> to vector<80x128xf32>
    %17 = arith.addf %14, %16 : vector<80x128xf32>
    %18 = arith.negf %17 : vector<80x128xf32>
    %19 = math.exp %18 : vector<80x128xf32>
    %cst_11 = arith.constant 1.000000e+00 : f32
    %20 = vector.broadcast %cst_11 : f32 to vector<80x128xf32>
    %21 = arith.addf %20, %19 : vector<80x128xf32>
    %22 = arith.divf %20, %21 : vector<80x128xf32>
    %23 = arith.mulf %17, %22 : vector<80x128xf32>
    %c0_12 = arith.constant 0 : index
    %c0_13 = arith.constant 0 : index
    %24 = vector.load %arg9[%c0_12, %c0_13] : memref<80x128xf32, #tpu.memory_space<vmem>>, vector<80x128xf32>
    tpu.vector_store %arg9[%c0_12, %c0_13], %23 {strides = array<i32>} : memref<80x128xf32, #tpu.memory_space<vmem>>, vector<80x128xf32>,
    %25 = arith.truncf %23 : vector<80x128xf32> to vector<80x128xbf16>
    %c0_14 = arith.constant 0 : index
    %c0_15 = arith.constant 0 : index
    %26 = vector.load %arg6[%c0_14, %c0_15] : memref<128x256xbf16, #tpu.memory_space<vmem>>, vector<128x256xbf16>
    %cst_16 = arith.constant dense<0.000000e+00> : vector<80x256xf32>
    %27 = tpu.matmul %25, %26, %cst_16 {dimension_numbers = #tpu.dot_dimension_numbers<[1], [0], [0], [1], [0, 0, 1, 1], [], []>} : vector<80x128xbf16>, vector<128x256xbf16>, vector<80x256xf32> -> vector<80x256xf32>
    %c0_17 = arith.constant 0 : index
    %c0_18 = arith.constant 0 : index
    %28 = vector.load %arg7[%c0_17, %c0_18] : memref<1x256xf32, #tpu.memory_space<vmem>>, vector<1x256xf32>
    %29 = vector.broadcast %28 : vector<1x256xf32> to vector<80x256xf32>
    %30 = arith.addf %27, %29 : vector<80x256xf32>
    %31 = arith.negf %30 : vector<80x256xf32>
    %32 = math.exp %31 : vector<80x256xf32>
    %cst_19 = arith.constant 1.000000e+00 : f32
    %33 = vector.broadcast %cst_19 : f32 to vector<80x256xf32>
    %34 = arith.addf %33, %32 : vector<80x256xf32>
    %35 = arith.divf %33, %34 : vector<80x256xf32>
    %36 = arith.mulf %30, %35 : vector<80x256xf32>
    %37 = arith.truncf %36 : vector<80x256xf32> to vector<80x256xbf16>
    %c0_20 = arith.constant 0 : index
    %c0_21 = arith.constant 0 : index
    %38 = vector.load %arg8[%c0_20, %c0_21] : memref<256x128xbf16, #tpu.memory_space<vmem>>, vector<256x128xbf16>
    %cst_22 = arith.constant dense<0.000000e+00> : vector<80x128xf32>
    %39 = tpu.matmul %37, %38, %cst_22 {dimension_numbers = #tpu.dot_dimension_numbers<[1], [0], [0], [1], [0, 0, 1, 1], [], []>} : vector<80x256xbf16>, vector<256x128xbf16>, vector<80x128xf32> -> vector<80x128xf32>
    %c0_23 = arith.constant 0 : index
    %c0_24 = arith.constant 0 : index
    %40 = vector.load %arg10[%c0_23, %c0_24] : memref<80x128xf32, #tpu.memory_space<vmem>>, vector<80x128xf32>
    tpu.vector_store %arg10[%c0_23, %c0_24], %39 {strides = array<i32>} : memref<80x128xf32, #tpu.memory_space<vmem>>, vector<80x128xf32>,
    return
  }
  func.func @transform_0(%arg0: i32) -> (i32, i32) {
    %c0_i32 = arith.constant 0 : i32
    %c0_i32_0 = arith.constant 0 : i32
    return %arg0, %c0_i32 : i32, i32
  }
  func.func @transform_1(%arg0: i32) -> (i32, i32) {
    %c0_i32 = arith.constant 0 : i32
    %c0_i32_0 = arith.constant 0 : i32
    %c0_i32_1 = arith.constant 0 : i32
    return %c0_i32, %c0_i32_0 : i32, i32
  }
  func.func @transform_2(%arg0: i32) -> (i32, i32) {
    %c0_i32 = arith.constant 0 : i32
    %c0_i32_0 = arith.constant 0 : i32
    %c0_i32_1 = arith.constant 0 : i32
    return %c0_i32, %c0_i32_0 : i32, i32
  }
  func.func @transform_3(%arg0: i32) -> (i32, i32) {
    %c0_i32 = arith.constant 0 : i32
    %c0_i32_0 = arith.constant 0 : i32
    %c0_i32_1 = arith.constant 0 : i32
    return %c0_i32, %c0_i32_0 : i32, i32
  }
  func.func @transform_4(%arg0: i32) -> (i32, i32) {
    %c0_i32 = arith.constant 0 : i32
    %c0_i32_0 = arith.constant 0 : i32
    %c0_i32_1 = arith.constant 0 : i32
    return %c0_i32, %c0_i32_0 : i32, i32
  }
  func.func @transform_5(%arg0: i32) -> (i32, i32) {
    %c0_i32 = arith.constant 0 : i32
    %c0_i32_0 = arith.constant 0 : i32
    %c0_i32_1 = arith.constant 0 : i32
    return %c0_i32, %c0_i32_0 : i32, i32
  }
  func.func @transform_6(%arg0: i32) -> (i32, i32) {
    %c0_i32 = arith.constant 0 : i32
    %c0_i32_0 = arith.constant 0 : i32
    %c0_i32_1 = arith.constant 0 : i32
    return %c0_i32, %c0_i32_0 : i32, i32
  }
  func.func @transform_7(%arg0: i32) -> (i32, i32) {
    %c0_i32 = arith.constant 0 : i32
    %c0_i32_0 = arith.constant 0 : i32
    %c0_i32_1 = arith.constant 0 : i32
    return %c0_i32, %c0_i32_0 : i32, i32
  }
  func.func @transform_8(%arg0: i32) -> (i32, i32) {
    %c0_i32 = arith.constant 0 : i32
    %c0_i32_0 = arith.constant 0 : i32
    return %arg0, %c0_i32 : i32, i32
  }
  func.func @transform_9(%arg0: i32) -> (i32, i32) {
    %c0_i32 = arith.constant 0 : i32
    %c0_i32_0 = arith.constant 0 : i32
    return %arg0, %c0_i32 : i32, i32
  }
}

module attributes {stable_mosaic.version = 11 : i64} {
  func.func @_edge_kernel(%arg0: i32, %arg1: memref<48x128xbf16, #tpu.memory_space<vmem>>, %arg2: memref<128x128xbf16, #tpu.memory_space<vmem>>, %arg3: memref<1x128xf32, #tpu.memory_space<vmem>>, %arg4: memref<128x128xbf16, #tpu.memory_space<vmem>>, %arg5: memref<1x128xf32, #tpu.memory_space<vmem>>, %arg6: memref<128x128xbf16, #tpu.memory_space<vmem>>, %arg7: memref<1x128xf32, #tpu.memory_space<vmem>>, %arg8: memref<128x128xbf16, #tpu.memory_space<vmem>>, %arg9: memref<48x128xf32, #tpu.memory_space<vmem>>, %arg10: memref<48x128xf32, #tpu.memory_space<vmem>>) attributes {dimension_semantics = [#tpu.dimension_semantics<parallel>], iteration_bounds = array<i64: 1>, scalar_prefetch = 0 : i64, scratch_operands = 0 : i64, tpu.core_type = #tpu.core_type<tc>, window_params = [{transform_indices = @transform_0, window_bounds = array<i64: 48, 128>}, {pipeline_mode = #tpu.pipeline_mode<synchronous>, transform_indices = @transform_1, window_bounds = array<i64: 128, 128>}, {pipeline_mode = #tpu.pipeline_mode<synchronous>, transform_indices = @transform_2, window_bounds = array<i64: 1, 128>}, {pipeline_mode = #tpu.pipeline_mode<synchronous>, transform_indices = @transform_3, window_bounds = array<i64: 128, 128>}, {pipeline_mode = #tpu.pipeline_mode<synchronous>, transform_indices = @transform_4, window_bounds = array<i64: 1, 128>}, {pipeline_mode = #tpu.pipeline_mode<synchronous>, transform_indices = @transform_5, window_bounds = array<i64: 128, 128>}, {pipeline_mode = #tpu.pipeline_mode<synchronous>, transform_indices = @transform_6, window_bounds = array<i64: 1, 128>}, {pipeline_mode = #tpu.pipeline_mode<synchronous>, transform_indices = @transform_7, window_bounds = array<i64: 128, 128>}, {transform_indices = @transform_8, window_bounds = array<i64: 48, 128>}, {transform_indices = @transform_9, window_bounds = array<i64: 48, 128>}]} {
    %c0 = arith.constant 0 : index
    %c0_0 = arith.constant 0 : index
    %0 = vector.load %arg1[%c0, %c0_0] : memref<48x128xbf16, #tpu.memory_space<vmem>>, vector<48x128xbf16>
    %c0_1 = arith.constant 0 : index
    %c0_2 = arith.constant 0 : index
    %1 = vector.load %arg2[%c0_1, %c0_2] : memref<128x128xbf16, #tpu.memory_space<vmem>>, vector<128x128xbf16>
    %cst = arith.constant dense<0.000000e+00> : vector<48x128xf32>
    %2 = tpu.matmul %0, %1, %cst {dimension_numbers = #tpu.dot_dimension_numbers<[1], [0], [0], [1], [0, 0, 1, 1], [], []>} : vector<48x128xbf16>, vector<128x128xbf16>, vector<48x128xf32> -> vector<48x128xf32>
    %c0_3 = arith.constant 0 : index
    %c0_4 = arith.constant 0 : index
    %3 = vector.load %arg3[%c0_3, %c0_4] : memref<1x128xf32, #tpu.memory_space<vmem>>, vector<1x128xf32>
    %4 = vector.broadcast %3 : vector<1x128xf32> to vector<48x128xf32>
    %5 = arith.addf %2, %4 : vector<48x128xf32>
    %6 = arith.negf %5 : vector<48x128xf32>
    %7 = math.exp %6 : vector<48x128xf32>
    %cst_5 = arith.constant 1.000000e+00 : f32
    %8 = vector.broadcast %cst_5 : f32 to vector<48x128xf32>
    %9 = arith.addf %8, %7 : vector<48x128xf32>
    %10 = arith.divf %8, %9 : vector<48x128xf32>
    %11 = arith.mulf %5, %10 : vector<48x128xf32>
    %12 = arith.truncf %11 : vector<48x128xf32> to vector<48x128xbf16>
    %c0_6 = arith.constant 0 : index
    %c0_7 = arith.constant 0 : index
    %13 = vector.load %arg4[%c0_6, %c0_7] : memref<128x128xbf16, #tpu.memory_space<vmem>>, vector<128x128xbf16>
    %cst_8 = arith.constant dense<0.000000e+00> : vector<48x128xf32>
    %14 = tpu.matmul %12, %13, %cst_8 {dimension_numbers = #tpu.dot_dimension_numbers<[1], [0], [0], [1], [0, 0, 1, 1], [], []>} : vector<48x128xbf16>, vector<128x128xbf16>, vector<48x128xf32> -> vector<48x128xf32>
    %c0_9 = arith.constant 0 : index
    %c0_10 = arith.constant 0 : index
    %15 = vector.load %arg5[%c0_9, %c0_10] : memref<1x128xf32, #tpu.memory_space<vmem>>, vector<1x128xf32>
    %16 = vector.broadcast %15 : vector<1x128xf32> to vector<48x128xf32>
    %17 = arith.addf %14, %16 : vector<48x128xf32>
    %18 = arith.negf %17 : vector<48x128xf32>
    %19 = math.exp %18 : vector<48x128xf32>
    %cst_11 = arith.constant 1.000000e+00 : f32
    %20 = vector.broadcast %cst_11 : f32 to vector<48x128xf32>
    %21 = arith.addf %20, %19 : vector<48x128xf32>
    %22 = arith.divf %20, %21 : vector<48x128xf32>
    %23 = arith.mulf %17, %22 : vector<48x128xf32>
    %c0_12 = arith.constant 0 : index
    %c0_13 = arith.constant 0 : index
    %24 = vector.load %arg9[%c0_12, %c0_13] : memref<48x128xf32, #tpu.memory_space<vmem>>, vector<48x128xf32>
    tpu.vector_store %arg9[%c0_12, %c0_13], %23 {strides = array<i32>} : memref<48x128xf32, #tpu.memory_space<vmem>>, vector<48x128xf32>,
    %25 = arith.truncf %23 : vector<48x128xf32> to vector<48x128xbf16>
    %c0_14 = arith.constant 0 : index
    %c0_15 = arith.constant 0 : index
    %26 = vector.load %arg6[%c0_14, %c0_15] : memref<128x128xbf16, #tpu.memory_space<vmem>>, vector<128x128xbf16>
    %cst_16 = arith.constant dense<0.000000e+00> : vector<48x128xf32>
    %27 = tpu.matmul %25, %26, %cst_16 {dimension_numbers = #tpu.dot_dimension_numbers<[1], [0], [0], [1], [0, 0, 1, 1], [], []>} : vector<48x128xbf16>, vector<128x128xbf16>, vector<48x128xf32> -> vector<48x128xf32>
    %c0_17 = arith.constant 0 : index
    %c0_18 = arith.constant 0 : index
    %28 = vector.load %arg7[%c0_17, %c0_18] : memref<1x128xf32, #tpu.memory_space<vmem>>, vector<1x128xf32>
    %29 = vector.broadcast %28 : vector<1x128xf32> to vector<48x128xf32>
    %30 = arith.addf %27, %29 : vector<48x128xf32>
    %31 = arith.negf %30 : vector<48x128xf32>
    %32 = math.exp %31 : vector<48x128xf32>
    %cst_19 = arith.constant 1.000000e+00 : f32
    %33 = vector.broadcast %cst_19 : f32 to vector<48x128xf32>
    %34 = arith.addf %33, %32 : vector<48x128xf32>
    %35 = arith.divf %33, %34 : vector<48x128xf32>
    %36 = arith.mulf %30, %35 : vector<48x128xf32>
    %37 = arith.truncf %36 : vector<48x128xf32> to vector<48x128xbf16>
    %c0_20 = arith.constant 0 : index
    %c0_21 = arith.constant 0 : index
    %38 = vector.load %arg8[%c0_20, %c0_21] : memref<128x128xbf16, #tpu.memory_space<vmem>>, vector<128x128xbf16>
    %cst_22 = arith.constant dense<0.000000e+00> : vector<48x128xf32>
    %39 = tpu.matmul %37, %38, %cst_22 {dimension_numbers = #tpu.dot_dimension_numbers<[1], [0], [0], [1], [0, 0, 1, 1], [], []>} : vector<48x128xbf16>, vector<128x128xbf16>, vector<48x128xf32> -> vector<48x128xf32>
    %c0_23 = arith.constant 0 : index
    %c0_24 = arith.constant 0 : index
    %40 = vector.load %arg10[%c0_23, %c0_24] : memref<48x128xf32, #tpu.memory_space<vmem>>, vector<48x128xf32>
    tpu.vector_store %arg10[%c0_23, %c0_24], %39 {strides = array<i32>} : memref<48x128xf32, #tpu.memory_space<vmem>>, vector<48x128xf32>,
    return
  }
  func.func @transform_0(%arg0: i32) -> (i32, i32) {
    %c0_i32 = arith.constant 0 : i32
    %c0_i32_0 = arith.constant 0 : i32
    return %arg0, %c0_i32 : i32, i32
  }
  func.func @transform_1(%arg0: i32) -> (i32, i32) {
    %c0_i32 = arith.constant 0 : i32
    %c0_i32_0 = arith.constant 0 : i32
    %c0_i32_1 = arith.constant 0 : i32
    return %c0_i32, %c0_i32_0 : i32, i32
  }
  func.func @transform_2(%arg0: i32) -> (i32, i32) {
    %c0_i32 = arith.constant 0 : i32
    %c0_i32_0 = arith.constant 0 : i32
    %c0_i32_1 = arith.constant 0 : i32
    return %c0_i32, %c0_i32_0 : i32, i32
  }
  func.func @transform_3(%arg0: i32) -> (i32, i32) {
    %c0_i32 = arith.constant 0 : i32
    %c0_i32_0 = arith.constant 0 : i32
    %c0_i32_1 = arith.constant 0 : i32
    return %c0_i32, %c0_i32_0 : i32, i32
  }
  func.func @transform_4(%arg0: i32) -> (i32, i32) {
    %c0_i32 = arith.constant 0 : i32
    %c0_i32_0 = arith.constant 0 : i32
    %c0_i32_1 = arith.constant 0 : i32
    return %c0_i32, %c0_i32_0 : i32, i32
  }
  func.func @transform_5(%arg0: i32) -> (i32, i32) {
    %c0_i32 = arith.constant 0 : i32
    %c0_i32_0 = arith.constant 0 : i32
    %c0_i32_1 = arith.constant 0 : i32
    return %c0_i32, %c0_i32_0 : i32, i32
  }
  func.func @transform_6(%arg0: i32) -> (i32, i32) {
    %c0_i32 = arith.constant 0 : i32
    %c0_i32_0 = arith.constant 0 : i32
    %c0_i32_1 = arith.constant 0 : i32
    return %c0_i32, %c0_i32_0 : i32, i32
  }
  func.func @transform_7(%arg0: i32) -> (i32, i32) {
    %c0_i32 = arith.constant 0 : i32
    %c0_i32_0 = arith.constant 0 : i32
    %c0_i32_1 = arith.constant 0 : i32
    return %c0_i32, %c0_i32_0 : i32, i32
  }
  func.func @transform_8(%arg0: i32) -> (i32, i32) {
    %c0_i32 = arith.constant 0 : i32
    %c0_i32_0 = arith.constant 0 : i32
    return %arg0, %c0_i32 : i32, i32
  }
  func.func @transform_9(%arg0: i32) -> (i32, i32) {
    %c0_i32 = arith.constant 0 : i32
    %c0_i32_0 = arith.constant 0 : i32
    return %arg0, %c0_i32 : i32, i32
  }
}

module attributes {stable_mosaic.version = 11 : i64} {
  func.func @_node_kernel(%arg0: i32, %arg1: memref<32x256xbf16, #tpu.memory_space<vmem>>, %arg2: memref<256x128xbf16, #tpu.memory_space<vmem>>, %arg3: memref<1x128xf32, #tpu.memory_space<vmem>>, %arg4: memref<128x128xbf16, #tpu.memory_space<vmem>>, %arg5: memref<1x128xf32, #tpu.memory_space<vmem>>, %arg6: memref<256x128xbf16, #tpu.memory_space<vmem>>, %arg7: memref<1x128xf32, #tpu.memory_space<vmem>>, %arg8: memref<128x128xbf16, #tpu.memory_space<vmem>>, %arg9: memref<1x128xf32, #tpu.memory_space<vmem>>, %arg10: memref<32x128xf32, #tpu.memory_space<vmem>>, %arg11: memref<32x128xf32, #tpu.memory_space<vmem>>) attributes {dimension_semantics = [#tpu.dimension_semantics<parallel>], iteration_bounds = array<i64: 1>, scalar_prefetch = 0 : i64, scratch_operands = 0 : i64, tpu.core_type = #tpu.core_type<tc>, window_params = [{transform_indices = @transform_0, window_bounds = array<i64: 32, 256>}, {pipeline_mode = #tpu.pipeline_mode<synchronous>, transform_indices = @transform_1, window_bounds = array<i64: 256, 128>}, {pipeline_mode = #tpu.pipeline_mode<synchronous>, transform_indices = @transform_2, window_bounds = array<i64: 1, 128>}, {pipeline_mode = #tpu.pipeline_mode<synchronous>, transform_indices = @transform_3, window_bounds = array<i64: 128, 128>}, {pipeline_mode = #tpu.pipeline_mode<synchronous>, transform_indices = @transform_4, window_bounds = array<i64: 1, 128>}, {pipeline_mode = #tpu.pipeline_mode<synchronous>, transform_indices = @transform_5, window_bounds = array<i64: 256, 128>}, {pipeline_mode = #tpu.pipeline_mode<synchronous>, transform_indices = @transform_6, window_bounds = array<i64: 1, 128>}, {pipeline_mode = #tpu.pipeline_mode<synchronous>, transform_indices = @transform_7, window_bounds = array<i64: 128, 128>}, {pipeline_mode = #tpu.pipeline_mode<synchronous>, transform_indices = @transform_8, window_bounds = array<i64: 1, 128>}, {transform_indices = @transform_9, window_bounds = array<i64: 32, 128>}, {transform_indices = @transform_10, window_bounds = array<i64: 32, 128>}]} {
    %c0 = arith.constant 0 : index
    %c0_0 = arith.constant 0 : index
    %0 = vector.load %arg1[%c0, %c0_0] : memref<32x256xbf16, #tpu.memory_space<vmem>>, vector<32x256xbf16>
    %c0_1 = arith.constant 0 : index
    %c0_2 = arith.constant 0 : index
    %1 = vector.load %arg2[%c0_1, %c0_2] : memref<256x128xbf16, #tpu.memory_space<vmem>>, vector<256x128xbf16>
    %cst = arith.constant dense<0.000000e+00> : vector<32x128xf32>
    %2 = tpu.matmul %0, %1, %cst {dimension_numbers = #tpu.dot_dimension_numbers<[1], [0], [0], [1], [0, 0, 1, 1], [], []>} : vector<32x256xbf16>, vector<256x128xbf16>, vector<32x128xf32> -> vector<32x128xf32>
    %c0_3 = arith.constant 0 : index
    %c0_4 = arith.constant 0 : index
    %3 = vector.load %arg3[%c0_3, %c0_4] : memref<1x128xf32, #tpu.memory_space<vmem>>, vector<1x128xf32>
    %4 = vector.broadcast %3 : vector<1x128xf32> to vector<32x128xf32>
    %5 = arith.addf %2, %4 : vector<32x128xf32>
    %6 = arith.negf %5 : vector<32x128xf32>
    %7 = math.exp %6 : vector<32x128xf32>
    %cst_5 = arith.constant 1.000000e+00 : f32
    %8 = vector.broadcast %cst_5 : f32 to vector<32x128xf32>
    %9 = arith.addf %8, %7 : vector<32x128xf32>
    %10 = arith.divf %8, %9 : vector<32x128xf32>
    %11 = arith.mulf %5, %10 : vector<32x128xf32>
    %12 = arith.truncf %11 : vector<32x128xf32> to vector<32x128xbf16>
    %c0_6 = arith.constant 0 : index
    %c0_7 = arith.constant 0 : index
    %13 = vector.load %arg4[%c0_6, %c0_7] : memref<128x128xbf16, #tpu.memory_space<vmem>>, vector<128x128xbf16>
    %cst_8 = arith.constant dense<0.000000e+00> : vector<32x128xf32>
    %14 = tpu.matmul %12, %13, %cst_8 {dimension_numbers = #tpu.dot_dimension_numbers<[1], [0], [0], [1], [0, 0, 1, 1], [], []>} : vector<32x128xbf16>, vector<128x128xbf16>, vector<32x128xf32> -> vector<32x128xf32>
    %c0_9 = arith.constant 0 : index
    %c0_10 = arith.constant 0 : index
    %15 = vector.load %arg5[%c0_9, %c0_10] : memref<1x128xf32, #tpu.memory_space<vmem>>, vector<1x128xf32>
    %16 = vector.broadcast %15 : vector<1x128xf32> to vector<32x128xf32>
    %17 = arith.addf %14, %16 : vector<32x128xf32>
    %c0_11 = arith.constant 0 : index
    %c0_12 = arith.constant 0 : index
    %18 = vector.load %arg10[%c0_11, %c0_12] : memref<32x128xf32, #tpu.memory_space<vmem>>, vector<32x128xf32>
    tpu.vector_store %arg10[%c0_11, %c0_12], %17 {strides = array<i32>} : memref<32x128xf32, #tpu.memory_space<vmem>>, vector<32x128xf32>,
    %c0_13 = arith.constant 0 : index
    %c0_14 = arith.constant 0 : index
    %19 = vector.load %arg6[%c0_13, %c0_14] : memref<256x128xbf16, #tpu.memory_space<vmem>>, vector<256x128xbf16>
    %cst_15 = arith.constant dense<0.000000e+00> : vector<32x128xf32>
    %20 = tpu.matmul %0, %19, %cst_15 {dimension_numbers = #tpu.dot_dimension_numbers<[1], [0], [0], [1], [0, 0, 1, 1], [], []>} : vector<32x256xbf16>, vector<256x128xbf16>, vector<32x128xf32> -> vector<32x128xf32>
    %c0_16 = arith.constant 0 : index
    %c0_17 = arith.constant 0 : index
    %21 = vector.load %arg7[%c0_16, %c0_17] : memref<1x128xf32, #tpu.memory_space<vmem>>, vector<1x128xf32>
    %22 = vector.broadcast %21 : vector<1x128xf32> to vector<32x128xf32>
    %23 = arith.addf %20, %22 : vector<32x128xf32>
    %24 = arith.negf %23 : vector<32x128xf32>
    %25 = math.exp %24 : vector<32x128xf32>
    %cst_18 = arith.constant 1.000000e+00 : f32
    %26 = vector.broadcast %cst_18 : f32 to vector<32x128xf32>
    %27 = arith.addf %26, %25 : vector<32x128xf32>
    %28 = arith.divf %26, %27 : vector<32x128xf32>
    %29 = arith.mulf %23, %28 : vector<32x128xf32>
    %30 = arith.truncf %29 : vector<32x128xf32> to vector<32x128xbf16>
    %c0_19 = arith.constant 0 : index
    %c0_20 = arith.constant 0 : index
    %31 = vector.load %arg8[%c0_19, %c0_20] : memref<128x128xbf16, #tpu.memory_space<vmem>>, vector<128x128xbf16>
    %cst_21 = arith.constant dense<0.000000e+00> : vector<32x128xf32>
    %32 = tpu.matmul %30, %31, %cst_21 {dimension_numbers = #tpu.dot_dimension_numbers<[1], [0], [0], [1], [0, 0, 1, 1], [], []>} : vector<32x128xbf16>, vector<128x128xbf16>, vector<32x128xf32> -> vector<32x128xf32>
    %c0_22 = arith.constant 0 : index
    %c0_23 = arith.constant 0 : index
    %33 = vector.load %arg9[%c0_22, %c0_23] : memref<1x128xf32, #tpu.memory_space<vmem>>, vector<1x128xf32>
    %34 = vector.broadcast %33 : vector<1x128xf32> to vector<32x128xf32>
    %35 = arith.addf %32, %34 : vector<32x128xf32>
    %c0_24 = arith.constant 0 : index
    %c0_25 = arith.constant 0 : index
    %36 = vector.load %arg11[%c0_24, %c0_25] : memref<32x128xf32, #tpu.memory_space<vmem>>, vector<32x128xf32>
    tpu.vector_store %arg11[%c0_24, %c0_25], %35 {strides = array<i32>} : memref<32x128xf32, #tpu.memory_space<vmem>>, vector<32x128xf32>,
    return
  }
  func.func @transform_0(%arg0: i32) -> (i32, i32) {
    %c0_i32 = arith.constant 0 : i32
    %c0_i32_0 = arith.constant 0 : i32
    return %arg0, %c0_i32 : i32, i32
  }
  func.func @transform_1(%arg0: i32) -> (i32, i32) {
    %c0_i32 = arith.constant 0 : i32
    %c0_i32_0 = arith.constant 0 : i32
    %c0_i32_1 = arith.constant 0 : i32
    return %c0_i32, %c0_i32_0 : i32, i32
  }
  func.func @transform_2(%arg0: i32) -> (i32, i32) {
    %c0_i32 = arith.constant 0 : i32
    %c0_i32_0 = arith.constant 0 : i32
    %c0_i32_1 = arith.constant 0 : i32
    return %c0_i32, %c0_i32_0 : i32, i32
  }
  func.func @transform_3(%arg0: i32) -> (i32, i32) {
    %c0_i32 = arith.constant 0 : i32
    %c0_i32_0 = arith.constant 0 : i32
    %c0_i32_1 = arith.constant 0 : i32
    return %c0_i32, %c0_i32_0 : i32, i32
  }
  func.func @transform_4(%arg0: i32) -> (i32, i32) {
    %c0_i32 = arith.constant 0 : i32
    %c0_i32_0 = arith.constant 0 : i32
    %c0_i32_1 = arith.constant 0 : i32
    return %c0_i32, %c0_i32_0 : i32, i32
  }
  func.func @transform_5(%arg0: i32) -> (i32, i32) {
    %c0_i32 = arith.constant 0 : i32
    %c0_i32_0 = arith.constant 0 : i32
    %c0_i32_1 = arith.constant 0 : i32
    return %c0_i32, %c0_i32_0 : i32, i32
  }
  func.func @transform_6(%arg0: i32) -> (i32, i32) {
    %c0_i32 = arith.constant 0 : i32
    %c0_i32_0 = arith.constant 0 : i32
    %c0_i32_1 = arith.constant 0 : i32
    return %c0_i32, %c0_i32_0 : i32, i32
  }
  func.func @transform_7(%arg0: i32) -> (i32, i32) {
    %c0_i32 = arith.constant 0 : i32
    %c0_i32_0 = arith.constant 0 : i32
    %c0_i32_1 = arith.constant 0 : i32
    return %c0_i32, %c0_i32_0 : i32, i32
  }
  func.func @transform_8(%arg0: i32) -> (i32, i32) {
    %c0_i32 = arith.constant 0 : i32
    %c0_i32_0 = arith.constant 0 : i32
    %c0_i32_1 = arith.constant 0 : i32
    return %c0_i32, %c0_i32_0 : i32, i32
  }
  func.func @transform_9(%arg0: i32) -> (i32, i32) {
    %c0_i32 = arith.constant 0 : i32
    %c0_i32_0 = arith.constant 0 : i32
    return %arg0, %c0_i32 : i32, i32
  }
  func.func @transform_10(%arg0: i32) -> (i32, i32) {
    %c0_i32 = arith.constant 0 : i32
    %c0_i32_0 = arith.constant 0 : i32
    return %arg0, %c0_i32 : i32, i32
  }
}

module attributes {stable_mosaic.version = 11 : i64} {
  func.func @_vnode_kernel(%arg0: i32, %arg1: memref<16x128xbf16, #tpu.memory_space<vmem>>, %arg2: memref<128x128xbf16, #tpu.memory_space<vmem>>, %arg3: memref<1x128xf32, #tpu.memory_space<vmem>>, %arg4: memref<128x128xbf16, #tpu.memory_space<vmem>>, %arg5: memref<1x128xf32, #tpu.memory_space<vmem>>, %arg6: memref<16x128xf32, #tpu.memory_space<vmem>>) attributes {dimension_semantics = [#tpu.dimension_semantics<parallel>], iteration_bounds = array<i64: 1>, scalar_prefetch = 0 : i64, scratch_operands = 0 : i64, tpu.core_type = #tpu.core_type<tc>, window_params = [{transform_indices = @transform_0, window_bounds = array<i64: 16, 128>}, {pipeline_mode = #tpu.pipeline_mode<synchronous>, transform_indices = @transform_1, window_bounds = array<i64: 128, 128>}, {pipeline_mode = #tpu.pipeline_mode<synchronous>, transform_indices = @transform_2, window_bounds = array<i64: 1, 128>}, {pipeline_mode = #tpu.pipeline_mode<synchronous>, transform_indices = @transform_3, window_bounds = array<i64: 128, 128>}, {pipeline_mode = #tpu.pipeline_mode<synchronous>, transform_indices = @transform_4, window_bounds = array<i64: 1, 128>}, {transform_indices = @transform_5, window_bounds = array<i64: 16, 128>}]} {
    %c0 = arith.constant 0 : index
    %c0_0 = arith.constant 0 : index
    %0 = vector.load %arg1[%c0, %c0_0] : memref<16x128xbf16, #tpu.memory_space<vmem>>, vector<16x128xbf16>
    %c0_1 = arith.constant 0 : index
    %c0_2 = arith.constant 0 : index
    %1 = vector.load %arg2[%c0_1, %c0_2] : memref<128x128xbf16, #tpu.memory_space<vmem>>, vector<128x128xbf16>
    %cst = arith.constant dense<0.000000e+00> : vector<16x128xf32>
    %2 = tpu.matmul %0, %1, %cst {dimension_numbers = #tpu.dot_dimension_numbers<[1], [0], [0], [1], [0, 0, 1, 1], [], []>} : vector<16x128xbf16>, vector<128x128xbf16>, vector<16x128xf32> -> vector<16x128xf32>
    %c0_3 = arith.constant 0 : index
    %c0_4 = arith.constant 0 : index
    %3 = vector.load %arg3[%c0_3, %c0_4] : memref<1x128xf32, #tpu.memory_space<vmem>>, vector<1x128xf32>
    %4 = vector.broadcast %3 : vector<1x128xf32> to vector<16x128xf32>
    %5 = arith.addf %2, %4 : vector<16x128xf32>
    %6 = arith.negf %5 : vector<16x128xf32>
    %7 = math.exp %6 : vector<16x128xf32>
    %cst_5 = arith.constant 1.000000e+00 : f32
    %8 = vector.broadcast %cst_5 : f32 to vector<16x128xf32>
    %9 = arith.addf %8, %7 : vector<16x128xf32>
    %10 = arith.divf %8, %9 : vector<16x128xf32>
    %11 = arith.mulf %5, %10 : vector<16x128xf32>
    %12 = arith.truncf %11 : vector<16x128xf32> to vector<16x128xbf16>
    %c0_6 = arith.constant 0 : index
    %c0_7 = arith.constant 0 : index
    %13 = vector.load %arg4[%c0_6, %c0_7] : memref<128x128xbf16, #tpu.memory_space<vmem>>, vector<128x128xbf16>
    %cst_8 = arith.constant dense<0.000000e+00> : vector<16x128xf32>
    %14 = tpu.matmul %12, %13, %cst_8 {dimension_numbers = #tpu.dot_dimension_numbers<[1], [0], [0], [1], [0, 0, 1, 1], [], []>} : vector<16x128xbf16>, vector<128x128xbf16>, vector<16x128xf32> -> vector<16x128xf32>
    %c0_9 = arith.constant 0 : index
    %c0_10 = arith.constant 0 : index
    %15 = vector.load %arg5[%c0_9, %c0_10] : memref<1x128xf32, #tpu.memory_space<vmem>>, vector<1x128xf32>
    %16 = vector.broadcast %15 : vector<1x128xf32> to vector<16x128xf32>
    %17 = arith.addf %14, %16 : vector<16x128xf32>
    %c0_11 = arith.constant 0 : index
    %c0_12 = arith.constant 0 : index
    %18 = vector.load %arg6[%c0_11, %c0_12] : memref<16x128xf32, #tpu.memory_space<vmem>>, vector<16x128xf32>
    tpu.vector_store %arg6[%c0_11, %c0_12], %17 {strides = array<i32>} : memref<16x128xf32, #tpu.memory_space<vmem>>, vector<16x128xf32>,
    return
  }
  func.func @transform_0(%arg0: i32) -> (i32, i32) {
    %c0_i32 = arith.constant 0 : i32
    %c0_i32_0 = arith.constant 0 : i32
    return %arg0, %c0_i32 : i32, i32
  }
  func.func @transform_1(%arg0: i32) -> (i32, i32) {
    %c0_i32 = arith.constant 0 : i32
    %c0_i32_0 = arith.constant 0 : i32
    %c0_i32_1 = arith.constant 0 : i32
    return %c0_i32, %c0_i32_0 : i32, i32
  }
  func.func @transform_2(%arg0: i32) -> (i32, i32) {
    %c0_i32 = arith.constant 0 : i32
    %c0_i32_0 = arith.constant 0 : i32
    %c0_i32_1 = arith.constant 0 : i32
    return %c0_i32, %c0_i32_0 : i32, i32
  }
  func.func @transform_3(%arg0: i32) -> (i32, i32) {
    %c0_i32 = arith.constant 0 : i32
    %c0_i32_0 = arith.constant 0 : i32
    %c0_i32_1 = arith.constant 0 : i32
    return %c0_i32, %c0_i32_0 : i32, i32
  }
  func.func @transform_4(%arg0: i32) -> (i32, i32) {
    %c0_i32 = arith.constant 0 : i32
    %c0_i32_0 = arith.constant 0 : i32
    %c0_i32_1 = arith.constant 0 : i32
    return %c0_i32, %c0_i32_0 : i32, i32
  }
  func.func @transform_5(%arg0: i32) -> (i32, i32) {
    %c0_i32 = arith.constant 0 : i32
    %c0_i32_0 = arith.constant 0 : i32
    return %arg0, %c0_i32 : i32, i32
  }
}

</mosaic_0001>

<bundles_post_ra>
// kernel: mul.21
= control target key start
LH: loop header
LB: loop body
LE: loop exit
PB: predicated region body
PF: predicated region fallthrough
CT: control target
= control target key end

     0   :  { %s162_s8 = smov 116   ;;  %s163_s9 = smov 120   ;;  %vm7_vm0 = vcmask 31744   ;;  %s273_s0 = inlined_call_operand.vmem [shape: f32[80], index: 0, kind: input, shape index: {}]   ;;  %s274_s1 = inlined_call_operand.vmem [shape: f32[20,4], index: 1, kind: output, shape index: {}]  }
   0x1   :  { %v4_v0 = vld [vmem:[%s273_s0] sm:$0x1]  ;;  %s161_s0 = smov 124   ;;  %s164_s10 = smov 112  }
   0x2   :  { %5 = vst [vmem:[#allocation0] sm:$0x1] %v4_v0  ;;  %s165_s11 = smov 108   ;;  %s166_s12 = smov 104  }
   0x3   :  { %s167_s13 = smov 100   ;;  %s168_s14 = smov 96  }
   0x4   :  { %s169_s15 = smov 92   ;;  %s170_s16 = smov 88  }
   0x5   :  { %s171_s17 = smov 84   ;;  %s172_s18 = smov 80  }
   0x6   :  { %s173_s21 = smov 76   ;;  %s174_s22 = smov 72  }
   0x7   :  { %s175_s23 = smov 68   ;;  %s176_s24 = smov 64  }
   0x8   :  { %s177_s25 = smov 60   ;;  %s178_s26 = smov 56  }
   0x9   :  { %v9_v1 = vld [vmem:[#allocation0] sm:$0x1]   ;;  %s179_s27 = smov 52  }
   0xa   :  { %v21_v2 = vld [vmem:[#allocation0] sm:$0x1]   ;;  %10 = vrot.lane.b32.xlu0 %v9_v1, %s161_s0 }
   0xb   :  { %22 = vrot.lane.b32.xlu1 %v21_v2, %s162_s8  ;;  %v15_v3 = vld [vmem:[#allocation0] sm:$0x1]  }
   0xc   :  { %v27_v4 = vld [vmem:[#allocation0] sm:$0x1]  }
   0xd   :  { %v33_v5 = vld [vmem:[#allocation0] sm:$0x1]  }
   0xe   :  { %16 = vrot.lane.b32.xlu0 %v15_v3, %s163_s9  ;;  %v39_v6 = vld [vmem:[#allocation0] sm:$0x1]  }
   0xf   :  { %28 = vrot.lane.b32.xlu1 %v27_v4, %s164_s10  ;;  %v45_v7 = vld [vmem:[#allocation0] sm:$0x1]  }
  0x10   :  { %v51_v8 = vld [vmem:[#allocation0] sm:$0x1]  }
  0x11   :  { %v57_v9 = vld [vmem:[#allocation0] sm:$0x1]  }
  0x12   :  { %34 = vrot.lane.b32.xlu0 %v33_v5, %s165_s11  ;;  %v63_v10 = vld [vmem:[#allocation0] sm:$0x1]  }
  0x13   :  { %40 = vrot.lane.b32.xlu1 %v39_v6, %s166_s12  ;;  %v69_v11 = vld [vmem:[#allocation0] sm:$0x1]  }
  0x14   :  { %v75_v12 = vld [vmem:[#allocation0] sm:$0x1]  }
  0x15   :  { %v81_v13 = vld [vmem:[#allocation0] sm:$0x1]  }
  0x16   :  { %46 = vrot.lane.b32.xlu0 %v45_v7, %s167_s13  ;;  %v87_v14 = vld [vmem:[#allocation0] sm:$0x1]  }
  0x17   :  { %52 = vrot.lane.b32.xlu1 %v51_v8, %s168_s14  ;;  %v6_v15 = vld [vmem:[#allocation0] sm:$0x1]  }
  0x18   :  { %8 = vst.msk [vmem:[%s274_s1] sm:$0x1] %vm7_vm0, %v6_v15   ;;  %v93_v16 = vld [vmem:[#allocation0] sm:$0x1]  }
  0x19   :  { %v99_v17 = vld [vmem:[#allocation0] sm:$0x1]  }
  0x1a   :  { %58 = vrot.lane.b32.xlu0 %v57_v9, %s169_s15  ;;  %v105_v18 = vld [vmem:[#allocation0] sm:$0x1]  }
  0x1b   :  { %64 = vrot.lane.b32.xlu1 %v63_v10, %s170_s16  ;;  %v111_v19 = vld [vmem:[#allocation0] sm:$0x1]  }
  0x1c   :  { %v117_v20 = vld [vmem:[#allocation0] sm:$0x1]  }
  0x1e   :  { %70 = vrot.lane.b32.xlu0 %v69_v11, %s171_s17 }
  0x1f   :  { %76 = vrot.lane.b32.xlu1 %v75_v12, %s172_s18 }
  0x22   :  { %82 = vrot.lane.b32.xlu0 %v81_v13, %s173_s21 }
  0x23   :  { %88 = vrot.lane.b32.xlu1 %v87_v14, %s174_s22 }
  0x26   :  { %94 = vrot.lane.b32.xlu0 %v93_v16, %s175_s23 }
  0x27   :  { %100 = vrot.lane.b32.xlu1 %v99_v17, %s176_s24 }
  0x2a   :  { %106 = vrot.lane.b32.xlu0 %v105_v18, %s177_s25 }
  0x2b   :  { %112 = vrot.lane.b32.xlu1 %v111_v19, %s178_s26 }
  0x2e   :  { %118 = vrot.lane.b32.xlu0 %v117_v20, %s179_s27 }
  0x7c   :  { %v11_v21 = vpop.permute.xlu0 %10  }
  0x7d   :  { %v23_v22 = vpop.permute.xlu1 %22   ;;  %123 = vst.msk [vmem:[%s274_s1 + $0x1] sm:$0x1] %vm7_vm0, %v11_v21  }
  0x7e   :  { %125 = vst.msk [vmem:[%s274_s1 + $0x3] sm:$0x1] %vm7_vm0, %v23_v22  }
  0x80   :  { %v17_v23 = vpop.permute.xlu0 %16  }
  0x81   :  { %v29_v24 = vpop.permute.xlu1 %28   ;;  %124 = vst.msk [vmem:[%s274_s1 + $0x2] sm:$0x1] %vm7_vm0, %v17_v23  }
  0x82   :  { %126 = vst.msk [vmem:[%s274_s1 + $0x4] sm:$0x1] %vm7_vm0, %v29_v24  }
  0x84   :  { %v35_v25 = vpop.permute.xlu0 %34  }
  0x85   :  { %v41_v26 = vpop.permute.xlu1 %40   ;;  %127 = vst.msk [vmem:[%s274_s1 + $0x5] sm:$0x1] %vm7_vm0, %v35_v25  }
  0x86   :  { %128 = vst.msk [vmem:[%s274_s1 + $0x6] sm:$0x1] %vm7_vm0, %v41_v26  }
  0x88   :  { %v47_v27 = vpop.permute.xlu0 %46  }
  0x89   :  { %v53_v28 = vpop.permute.xlu1 %52   ;;  %129 = vst.msk [vmem:[%s274_s1 + $0x7] sm:$0x1] %vm7_vm0, %v47_v27  }
  0x8a   :  { %130 = vst.msk [vmem:[%s274_s1 + $0x8] sm:$0x1] %vm7_vm0, %v53_v28  }
  0x8c   :  { %v59_v29 = vpop.permute.xlu0 %58  }
  0x8d   :  { %v65_v30 = vpop.permute.xlu1 %64   ;;  %131 = vst.msk [vmem:[%s274_s1 + $0x9] sm:$0x1] %vm7_vm0, %v59_v29  }
  0x8e   :  { %132 = vst.msk [vmem:[%s274_s1 + $0xa] sm:$0x1] %vm7_vm0, %v65_v30  }
  0x90   :  { %v71_v31 = vpop.permute.xlu0 %70  }
  0x91   :  { %v77_v32 = vpop.permute.xlu1 %76   ;;  %133 = vst.msk [vmem:[%s274_s1 + $0xb] sm:$0x1] %vm7_vm0, %v71_v31  }
  0x92   :  { %134 = vst.msk [vmem:[%s274_s1 + $0xc] sm:$0x1] %vm7_vm0, %v77_v32  }
  0x94   :  { %v83_v33 = vpop.permute.xlu0 %82  }
  0x95   :  { %v89_v34 = vpop.permute.xlu1 %88   ;;  %135 = vst.msk [vmem:[%s274_s1 + $0xd] sm:$0x1] %vm7_vm0, %v83_v33  }
  0x96   :  { %136 = vst.msk [vmem:[%s274_s1 + $0xe] sm:$0x1] %vm7_vm0, %v89_v34  }
  0x98   :  { %v95_v35 = vpop.permute.xlu0 %94  }
  0x99   :  { %v101_v36 = vpop.permute.xlu1 %100   ;;  %137 = vst.msk [vmem:[%s274_s1 + $0xf] sm:$0x1] %vm7_vm0, %v95_v35  }
  0x9a   :  { %138 = vst.msk [vmem:[%s274_s1 + $0x10] sm:$0x1] %vm7_vm0, %v101_v36  }
  0x9c   :  { %v107_v37 = vpop.permute.xlu0 %106  }
  0x9d   :  { %v113_v38 = vpop.permute.xlu1 %112   ;;  %139 = vst.msk [vmem:[%s274_s1 + $0x11] sm:$0x1] %vm7_vm0, %v107_v37  }
  0x9e   :  { %140 = vst.msk [vmem:[%s274_s1 + $0x12] sm:$0x1] %vm7_vm0, %v113_v38  }
  0xa0   :  { %v119_v39 = vpop.permute.xlu0 %118  }
  0xa1   :  { %141 = vst.msk [vmem:[%s274_s1 + $0x13] sm:$0x1] %vm7_vm0, %v119_v39  }

// kernel: e_gcl_vel_forward.5
= control target key start
LH: loop header
LB: loop body
LE: loop exit
PB: predicated region body
PF: predicated region fallthrough
CT: control target
= control target key end

     0   :  { %v1543_v0 = vmov 0.0   ;;  %vm1544_vm0 = vmmov 0   ;;  %s2033_s1 = inlined_call_operand.vmem [shape: bf16[128,128], index: 1, kind: input, shape index: {}]   ;;  %s2034_s0 = inlined_call_operand.vmem [shape: bf16[80,128], index: 0, kind: input, shape index: {}]   ;;  %s2035_s3 = inlined_call_operand.vmem [shape: bf16[128,128], index: 3, kind: input, shape index: {}]   ;;  %s2036_s5 = inlined_call_operand.vmem [shape: bf16[128,256], index: 5, kind: input, shape index: {}]   ;;  %s2037_s2 = inlined_call_operand.vmem [shape: f32[1,128], index: 2, kind: input, shape index: {}]   ;;  %s2038_s7 = inlined_call_operand.vmem [shape: bf16[256,128], index: 7, kind: input, shape index: {}]   ;;  %s2039_s4 = inlined_call_operand.vmem [shape: f32[1,128], index: 4, kind: input, shape index: {}]   ;;  %s2040_s8 = inlined_call_operand.vmem [shape: f32[80,128], index: 8, kind: output, shape index: {0}]   ;;  %s2041_s6 = inlined_call_operand.vmem [shape: f32[1,256], index: 6, kind: input, shape index: {}]   ;;  %s2042_s9 = inlined_call_operand.vmem [shape: f32[80,128], index: 9, kind: output, shape index: {1}]  }
   0x1   :  { %1247 = vmatprep.subr.bf16.mxu0 %v1543_v0  ;;  %v1322_v1 = vld [vmem:[%s2033_s1] sm:$0xff]   ;;  %1263 = vmatprep.mubr.msk.bf16.mxu0 %vm1544_vm0, %v1543_v0  ;;  %v1323_v2 = vld [vmem:[%s2033_s1 + $0x8] sm:$0xff]   ;;  %v1324_v3 = vld [vmem:[%s2033_s1 + $0x10] sm:$0xff]  }
   0x2   :  { %1283 = vmatprep.subr.bf16.mxu1 %v1543_v0  ;;  %1299 = vmatprep.mubr.msk.bf16.mxu1 %vm1544_vm0, %v1543_v0  ;;  %v1325_v4 = vld [vmem:[%s2033_s1 + $0x18] sm:$0xff]   ;;  %v1326_v5 = vld [vmem:[%s2033_s1 + $0x20] sm:$0xff]   ;;  %v1327_v6 = vld [vmem:[%s2033_s1 + $0x28] sm:$0xff]  }
   0x3   :  { %1248 = vmatpush3.bf16.msra.mxu0 %v1322_v1  ;;  %v1328_v7 = vld [vmem:[%s2033_s1 + $0x30] sm:$0xff]   ;;  %v1329_v8 = vld [vmem:[%s2033_s1 + $0x38] sm:$0xff]   ;;  %v1330_v9 = vld [vmem:[%s2034_s0] sm:$0xff]  }
   0x4   :  { %1249 = vmatprep.subr.bf16.mxu0 %v1543_v0  ;;  %v1331_v10 = vld [vmem:[%s2034_s0 + $0x8] sm:$0xff]   ;;  %v1332_v11 = vld [vmem:[%s2034_s0 + $0x10] sm:$0xff]   ;;  %v1333_v12 = vld [vmem:[%s2034_s0 + $0x18] sm:$0xff]  }
   0x5   :  { %v1334_v13 = vld [vmem:[%s2034_s0 + $0x20] sm:$0xff]   ;;  %v1336_v15 = vld [vmem:[%s2035_s3 + $0x8] sm:$0xff]   ;;  %v1337_v16 = vld [vmem:[%s2035_s3 + $0x10] sm:$0xff]  }
   0x6   :  { %v1335_v14 = vld [vmem:[%s2035_s3] sm:$0xff]   ;;  %v1338_v17 = vld [vmem:[%s2035_s3 + $0x18] sm:$0xff]   ;;  %v1340_v19 = vld [vmem:[%s2035_s3 + $0x28] sm:$0xff]  }
   0x7   :  { %1250 = vmatpush3.bf16.msra.mxu0 %v1323_v2  ;;  %1284 = vmatpush3.bf16.msra.mxu1 %v1335_v14  ;;  %v1339_v18 = vld [vmem:[%s2035_s3 + $0x20] sm:$0xff]   ;;  %v1341_v20 = vld [vmem:[%s2035_s3 + $0x30] sm:$0xff]   ;;  %v1342_v21 = vld [vmem:[%s2035_s3 + $0x38] sm:$0xff]  }
   0x8   :  { %1251 = vmatprep.subr.bf16.mxu0 %v1543_v0  ;;  %1285 = vmatprep.subr.bf16.mxu1 %v1543_v0  ;;  %v1343_v22 = vld [vmem:[%s2036_s5] ss:$8 sps:$4 sm:$0xff]   ;;  %v1345_v23 = vld [vmem:[%s2036_s5 + $0x4] ss:$8 sps:$4 sm:$0xff]   ;;  %v1346_v24 = vld [vmem:[%s2036_s5 + $0x10] ss:$8 sps:$4 sm:$0xff]  }
   0x9   :  { %v1348_v25 = vld [vmem:[%s2036_s5 + $0x14] ss:$8 sps:$4 sm:$0xff]   ;;  %v1702_v26 = vld [vmem:[%s2037_s2] ss:$0 sm:$0xff] }
   0xb   :  { %1252 = vmatpush3.bf16.msra.mxu0 %v1324_v3  ;;  %1286 = vmatpush3.bf16.msra.mxu1 %v1336_v15 }
   0xc   :  { %1253 = vmatprep.subr.bf16.mxu0 %v1543_v0  ;;  %1287 = vmatprep.subr.bf16.mxu1 %v1543_v0 }
   0xf   :  { %1254 = vmatpush3.bf16.msra.mxu0 %v1325_v4  ;;  %1288 = vmatpush3.bf16.msra.mxu1 %v1337_v16 }
  0x10   :  { %1255 = vmatprep.subr.bf16.mxu0 %v1543_v0  ;;  %1289 = vmatprep.subr.bf16.mxu1 %v1543_v0 }
  0x13   :  { %1256 = vmatpush3.bf16.msra.mxu0 %v1326_v5  ;;  %1290 = vmatpush3.bf16.msra.mxu1 %v1338_v17 }
  0x14   :  { %1257 = vmatprep.subr.bf16.mxu0 %v1543_v0  ;;  %1291 = vmatprep.subr.bf16.mxu1 %v1543_v0 }
  0x17   :  { %1258 = vmatpush3.bf16.msra.mxu0 %v1327_v6  ;;  %1292 = vmatpush3.bf16.msra.mxu1 %v1339_v18 }
  0x18   :  { %1259 = vmatprep.subr.bf16.mxu0 %v1543_v0  ;;  %1293 = vmatprep.subr.bf16.mxu1 %v1543_v0 }
  0x1b   :  { %1260 = vmatpush3.bf16.msra.mxu0 %v1328_v7  ;;  %1294 = vmatpush3.bf16.msra.mxu1 %v1340_v19 }
  0x1c   :  { %1261 = vmatprep.subr.bf16.mxu0 %v1543_v0  ;;  %1295 = vmatprep.subr.bf16.mxu1 %v1543_v0 }
  0x1f   :  { %1262 = vmatpush3.bf16.msra.mxu0 %v1329_v8  ;;  %1296 = vmatpush3.bf16.msra.mxu1 %v1341_v20 }
  0x20   :  { %1297 = vmatprep.subr.bf16.mxu1 %v1543_v0  ;;  %628 = vmatprep.subr.bf16.mxu0 %v1345_v23 }
  0x22   :  { %1264 = vmatmul.mubr.bf16.vlgmr.msra.gmra.mrb[0].mxu0 %v1330_v9 }
  0x23   :  { %1267 = vmatprep.mubr.msk.bf16.mxu0 %vm1544_vm0, %v1543_v0  ;;  %1298 = vmatpush3.bf16.msra.mxu1 %v1342_v21 }
  0x24   :  { %629 = vmatpush1.bf16.msra.mxu0 %v1343_v22 }
  0x25   :  { %630 = vmatprep.subr.bf16.mxu0 %v1348_v25 }
  0x28   :  { %631 = vmatpush1.bf16.msra.mxu0 %v1346_v24 }
  0x2a   :  { %1268 = vmatmul.mubr.bf16.gmra.mrb[4].mxu0 %v1331_v10 }
  0x2b   :  { %1271 = vmatprep.mubr.msk.bf16.mxu0 %vm1544_vm0, %v1543_v0 }
  0x32   :  { %1272 = vmatmul.mubr.bf16.gmra.mrb[8].mxu0 %v1332_v11 }
  0x33   :  { %1275 = vmatprep.mubr.msk.bf16.mxu0 %vm1544_vm0, %v1543_v0 }
  0x3a   :  { %1276 = vmatmul.mubr.bf16.gmra.mrb[12].mxu0 %v1333_v12 }
  0x3b   :  { %1279 = vmatprep.mubr.msk.bf16.mxu0 %vm1544_vm0, %v1543_v0 }
  0x42   :  { %1280 = vmatmul.mubr.bf16.gmra.mrb[16].mxu0 %v1334_v13 }
  0xf5   :  { %v177_v27 = vpop.f32.mrb[0].mxu0 }
  0xf6   :  { %v178_v28 = vadd.f32 %v1702_v26, %v177_v27  ;;  %v1265_v29 = vpop.f32.mrb[1].mxu0 }
  0xf7   :  { %v180_v30 = vpop.f32.mrb[2].mxu0 }
  0xf8   :  { %v1094_v31 = vmul.f32 -1.442695, %v178_v28  ;;  %v181_v32 = vadd.f32 %v1702_v26, %v180_v30  ;;  %v1266_v33 = vpop.f32.mrb[3].mxu0 }
  0xfa   :  { %1383 = vpow2.f32 %v1094_v31  ;;  %v1095_v34 = vmul.f32 -1.442695, %v181_v32 }
  0xfc   :  { %1385 = vpow2.f32 %v1095_v34 }
  0xfd   :  { %v185_v35 = vpop.f32.mrb[4].mxu0 }
  0xfe   :  { %v1707_v36 = vadd.f32 %v1702_v26, %v185_v35  ;;  %v1269_v37 = vpop.f32.mrb[5].mxu0 }
  0xff   :  { %v188_v38 = vpop.f32.mrb[6].mxu0 }
 0x100   :  { %v1096_v39 = vmul.f32 -1.442695, %v1707_v36  ;;  %v1711_v40 = vadd.f32 %v1702_v26, %v188_v38  ;;  %v1270_v41 = vpop.f32.mrb[7].mxu0 }
 0x102   :  { %1387 = vpow2.f32 %v1096_v39  ;;  %v1097_v42 = vmul.f32 -1.442695, %v1711_v40 }
 0x104   :  { %v1384_v43 = vpop.eup %1383  ;;  %1389 = vpow2.f32 %v1097_v42 }
 0x105   :  { %v246_v44 = vadd.f32 1.0, %v1384_v43  ;;  %v193_v45 = vpop.f32.mrb[8].mxu0 }
 0x106   :  { %v1386_v46 = vpop.eup %1385  ;;  %v1715_v47 = vadd.f32 %v1702_v26, %v193_v45  ;;  %v1273_v48 = vpop.f32.mrb[9].mxu0 }
 0x107   :  { %1391 = vrcp.f32 %v246_v44  ;;  %v247_v49 = vadd.f32 1.0, %v1386_v46  ;;  %v196_v50 = vpop.f32.mrb[10].mxu0 }
 0x108   :  { %v1098_v51 = vmul.f32 -1.442695, %v1715_v47  ;;  %v197_v52 = vadd.f32 %v1702_v26, %v196_v50  ;;  %v1274_v53 = vpop.f32.mrb[11].mxu0  ;;  %v1349_v50 = vld [vmem:[%s2036_s5 + $0x20] ss:$8 sps:$4 sm:$0xff]  }
 0x109   :  { %1393 = vrcp.f32 %v247_v49  ;;  %v1351_v49 = vld [vmem:[%s2036_s5 + $0x24] ss:$8 sps:$4 sm:$0xff]   ;;  %v1355_v53 = vld [vmem:[%s2036_s5 + $0x40] ss:$8 sps:$4 sm:$0xff]  }
 0x10a   :  { %1395 = vpow2.f32 %v1098_v51  ;;  %v1099_v54 = vmul.f32 -1.442695, %v197_v52  ;;  %632 = vmatprep.subr.bf16.mxu0 %v1351_v49  ;;  %v1354_v51 = vld [vmem:[%s2036_s5 + $0x34] ss:$8 sps:$4 sm:$0xff]  }
 0x10b   :  { %633 = vmatpush1.bf16.msra.mxu0 %v1349_v50 }
 0x10c   :  { %v1388_v55 = vpop.eup %1387  ;;  %1397 = vpow2.f32 %v1099_v54  ;;  %634 = vmatprep.subr.bf16.mxu0 %v1354_v51  ;;  %v1360_v54 = vld [vmem:[%s2036_s5 + $0x54] ss:$8 sps:$4 sm:$0xff]  }
 0x10d   :  { %v248_v56 = vadd.f32 1.0, %v1388_v55  ;;  %v201_v57 = vpop.f32.mrb[12].mxu0  ;;  %v1358_v55 = vld [vmem:[%s2036_s5 + $0x50] ss:$8 sps:$4 sm:$0xff]  }
 0x10e   :  { %v1390_v58 = vpop.eup %1389  ;;  %v1720_v59 = vadd.f32 %v1702_v26, %v201_v57  ;;  %v1277_v60 = vpop.f32.mrb[13].mxu0  ;;  %v1361_v57 = vld [vmem:[%s2036_s5 + $0x60] ss:$8 sps:$4 sm:$0xff]  }
 0x10f   :  { %1399 = vrcp.f32 %v248_v56  ;;  %v249_v61 = vadd.f32 1.0, %v1390_v58  ;;  %v204_v62 = vpop.f32.mrb[14].mxu0  ;;  %v1363_v56 = vld [vmem:[%s2036_s5 + $0x64] ss:$8 sps:$4 sm:$0xff]   ;;  %v1366_v58 = vld [vmem:[%s2036_s5 + $0x74] ss:$8 sps:$4 sm:$0xff]  }
 0x110   :  { %v1100_v63 = vmul.f32 -1.442695, %v1720_v59  ;;  %v205_v1 = vadd.f32 %v1702_v26, %v204_v62  ;;  %v1278_v2 = vpop.f32.mrb[15].mxu0  ;;  %v1545_v60 = vmov 0   ;;  %v1368_v62 = vld [vmem:[%s2038_s7] sm:$0xff]  }
 0x111   :  { %v1392_v3 = vpop.eup %1391  ;;  %1401 = vrcp.f32 %v249_v61  ;;  %660 = vmatprep.mubr.bf16.mxu0 %v1545_v60  ;;  %v1367_v61 = vld [vmem:[%s2038_s7 + $0x40] sm:$0xff]  }
 0x112   :  { %1403 = vpow2.f32 %v1100_v63  ;;  %v1101_v4 = vmul.f32 -1.442695, %v205_v1  ;;  %v276_v7 = vmul.f32 %v1392_v3, %v178_v28  ;;  %1201 = vmatprep.subr.bf16.mxu1 %v1367_v61  ;;  %v1784_v63 = vld [vmem:[%s2039_s4] ss:$0 sm:$0xff] }
 0x113   :  { %v1394_v5 = vpop.eup %1393 }
 0x114   :  { %v1396_v6 = vpop.eup %1395  ;;  %v277_v8 = vmul.f32 %v1394_v5, %v181_v32  ;;  %1405 = vpow2.f32 %v1101_v4 }
 0x115   :  { %v250_v9 = vadd.f32 1.0, %v1396_v6  ;;  %v209_v10 = vpop.f32.mrb[16].mxu0 }
 0x116   :  { %v1398_v11 = vpop.eup %1397  ;;  %v210_v12 = vadd.f32 %v1702_v26, %v209_v10  ;;  %v1281_v13 = vpop.f32.mrb[17].mxu0  ;;  %v286_v14 = vpack.c.bf16 %v277_v8, %v276_v7 }
 0x117   :  { %1407 = vrcp.f32 %v250_v9  ;;  %v251_v15 = vadd.f32 1.0, %v1398_v11  ;;  %v212_v16 = vpop.f32.mrb[18].mxu0 }
 0x118   :  { %v1102_v17 = vmul.f32 -1.442695, %v210_v12  ;;  %v213_v18 = vadd.f32 %v1702_v26, %v212_v16  ;;  %v1282_v19 = vpop.f32.mrb[19].mxu0  ;;  %1300 = vmatmul.mubr.bf16.vlgmr.msra.gmra.mrb[0].mxu1 %v286_v14 }
 0x119   :  { %v1400_v20 = vpop.eup %1399  ;;  %1409 = vrcp.f32 %v251_v15  ;;  %1303 = vmatprep.mubr.msk.bf16.mxu1 %vm1544_vm0, %v1543_v0  ;;  %1202 = vmatpush3.bf16.msra.mxu1 %v1368_v62 }
 0x11a   :  { %1411 = vpow2.f32 %v1102_v17  ;;  %v1103_v21 = vmul.f32 -1.442695, %v213_v18  ;;  %v278_v24 = vmul.f32 %v1400_v20, %v1707_v36 }
 0x11b   :  { %v1402_v22 = vpop.eup %1401 }
 0x11c   :  { %v1404_v23 = vpop.eup %1403  ;;  %v279_v25 = vmul.f32 %v1402_v22, %v1711_v40  ;;  %1413 = vpow2.f32 %v1103_v21 }
 0x11d   :  { %v252_v27 = vadd.f32 1.0, %v1404_v23 }
 0x11e   :  { %v1406_v28 = vpop.eup %1405  ;;  %v287_v29 = vpack.c.bf16 %v279_v25, %v278_v24 }
 0x11f   :  { %1415 = vrcp.f32 %v252_v27  ;;  %v253_v26 = vadd.f32 1.0, %v1406_v28 }
 0x120   :  { %1304 = vmatmul.mubr.bf16.gmra.mrb[4].mxu1 %v287_v29 }
 0x121   :  { %v1408_v30 = vpop.eup %1407  ;;  %1417 = vrcp.f32 %v253_v26  ;;  %1307 = vmatprep.mubr.msk.bf16.mxu1 %vm1544_vm0, %v1543_v0 }
 0x122   :  { %v280_v33 = vmul.f32 %v1408_v30, %v1715_v47 }
 0x123   :  { %v1410_v31 = vpop.eup %1409 }
 0x124   :  { %v1412_v32 = vpop.eup %1411  ;;  %v281_v34 = vmul.f32 %v1410_v31, %v197_v52  ;;  %v1357_v52 = vld [vmem:[%s2036_s5 + $0x44] ss:$8 sps:$4 sm:$0xff]  }
 0x125   :  { %v254_v35 = vadd.f32 1.0, %v1412_v32 }
 0x126   :  { %v1414_v36 = vpop.eup %1413  ;;  %v288_v37 = vpack.c.bf16 %v281_v34, %v280_v33 }
 0x127   :  { %1419 = vrcp.f32 %v254_v35  ;;  %v255_v38 = vadd.f32 1.0, %v1414_v36 }
 0x128   :  { %1308 = vmatmul.mubr.bf16.gmra.mrb[8].mxu1 %v288_v37 }
 0x129   :  { %v1416_v39 = vpop.eup %1415  ;;  %1421 = vrcp.f32 %v255_v38  ;;  %1311 = vmatprep.mubr.msk.bf16.mxu1 %vm1544_vm0, %v1543_v0 }
 0x12a   :  { %v282_v41 = vmul.f32 %v1416_v39, %v1720_v59  ;;  %v1364_v59 = vld [vmem:[%s2036_s5 + $0x70] ss:$8 sps:$4 sm:$0xff]  }
 0x12b   :  { %v1418_v40 = vpop.eup %1417 }
 0x12c   :  { %v283_v42 = vmul.f32 %v1418_v40, %v205_v1 }
 0x12e   :  { %v289_v43 = vpack.c.bf16 %v283_v42, %v282_v41 }
 0x130   :  { %1312 = vmatmul.mubr.bf16.gmra.mrb[12].mxu1 %v289_v43 }
 0x131   :  { %v1420_v44 = vpop.eup %1419  ;;  %1315 = vmatprep.mubr.msk.bf16.mxu1 %vm1544_vm0, %v1543_v0  ;;  %v1352_v0 = vld [vmem:[%s2036_s5 + $0x30] ss:$8 sps:$4 sm:$0xff]  }
 0x132   :  { %v284_v46 = vmul.f32 %v1420_v44, %v210_v12  ;;  %635 = vmatpush1.bf16.msra.mxu0 %v1352_v0 }
 0x133   :  { %v1422_v45 = vpop.eup %1421  ;;  %636 = vmatprep.subr.bf16.mxu0 %v1357_v52 }
 0x134   :  { %v285_v47 = vmul.f32 %v1422_v45, %v213_v18 }
 0x136   :  { %v290_v48 = vpack.c.bf16 %v285_v47, %v284_v46  ;;  %637 = vmatpush1.bf16.msra.mxu0 %v1355_v53 }
 0x137   :  { %638 = vmatprep.subr.bf16.mxu0 %v1360_v54 }
 0x138   :  { %1316 = vmatmul.mubr.bf16.gmra.mrb[16].mxu1 %v290_v48 }
 0x13a   :  { %639 = vmatpush1.bf16.msra.mxu0 %v1358_v55 }
 0x13b   :  { %640 = vmatprep.subr.bf16.mxu0 %v1363_v56 }
 0x13e   :  { %641 = vmatpush1.bf16.msra.mxu0 %v1361_v57 }
 0x13f   :  { %642 = vmatprep.subr.bf16.mxu0 %v1366_v58 }
 0x142   :  { %643 = vmatpush1.bf16.msra.mxu0 %v1364_v59 }
 0x1eb   :  { %v396_v1 = vpop.f32.mrb[0].mxu1 }
 0x1ec   :  { %v397_v2 = vadd.f32 %v1784_v63, %v396_v1  ;;  %v1301_v3 = vpop.f32.mrb[1].mxu1 }
 0x1ed   :  { %v399_v4 = vpop.f32.mrb[2].mxu1 }
 0x1ee   :  { %v1113_v5 = vmul.f32 -1.442695, %v397_v2  ;;  %v400_v6 = vadd.f32 %v1784_v63, %v399_v4  ;;  %v1302_v7 = vpop.f32.mrb[3].mxu1 }
 0x1f0   :  { %1423 = vpow2.f32 %v1113_v5  ;;  %v1114_v8 = vmul.f32 -1.442695, %v400_v6 }
 0x1f2   :  { %1425 = vpow2.f32 %v1114_v8 }
 0x1f3   :  { %v404_v9 = vpop.f32.mrb[4].mxu1 }
 0x1f4   :  { %v1789_v10 = vadd.f32 %v1784_v63, %v404_v9  ;;  %v1305_v11 = vpop.f32.mrb[5].mxu1 }
 0x1f5   :  { %v407_v12 = vpop.f32.mrb[6].mxu1 }
 0x1f6   :  { %v1115_v13 = vmul.f32 -1.442695, %v1789_v10  ;;  %v1793_v14 = vadd.f32 %v1784_v63, %v407_v12  ;;  %v1306_v15 = vpop.f32.mrb[7].mxu1 }
 0x1f8   :  { %1427 = vpow2.f32 %v1115_v13  ;;  %v1116_v16 = vmul.f32 -1.442695, %v1793_v14 }
 0x1fa   :  { %v1424_v17 = vpop.eup %1423  ;;  %1429 = vpow2.f32 %v1116_v16 }
 0x1fb   :  { %v465_v18 = vadd.f32 1.0, %v1424_v17  ;;  %v412_v19 = vpop.f32.mrb[8].mxu1 }
 0x1fc   :  { %v1426_v20 = vpop.eup %1425  ;;  %v1797_v21 = vadd.f32 %v1784_v63, %v412_v19  ;;  %v1309_v22 = vpop.f32.mrb[9].mxu1 }
 0x1fd   :  { %1431 = vrcp.f32 %v465_v18  ;;  %v466_v23 = vadd.f32 1.0, %v1426_v20  ;;  %v415_v24 = vpop.f32.mrb[10].mxu1 }
 0x1fe   :  { %v1117_v25 = vmul.f32 -1.442695, %v1797_v21  ;;  %v1801_v27 = vadd.f32 %v1784_v63, %v415_v24  ;;  %v1310_v28 = vpop.f32.mrb[11].mxu1  ;;  %v1371_v24 = vld [vmem:[%s2038_s7 + $0x50] sm:$0xff]  }
 0x1ff   :  { %1433 = vrcp.f32 %v466_v23  ;;  %v1369_v23 = vld [vmem:[%s2038_s7 + $0x48] sm:$0xff]   ;;  %v1374_v28 = vld [vmem:[%s2038_s7 + $0x18] sm:$0xff]  }
 0x200   :  { %1435 = vpow2.f32 %v1117_v25  ;;  %v1118_v29 = vmul.f32 -1.442695, %v1801_v27  ;;  %1203 = vmatprep.subr.bf16.mxu1 %v1369_v23  ;;  %v1372_v25 = vld [vmem:[%s2038_s7 + $0x10] sm:$0xff]  }
 0x202   :  { %v1428_v26 = vpop.eup %1427  ;;  %1437 = vpow2.f32 %v1118_v29  ;;  %v1375_v29 = vld [vmem:[%s2038_s7 + $0x60] sm:$0xff]  }
 0x203   :  { %v467_v30 = vadd.f32 1.0, %v1428_v26  ;;  %v420_v31 = vpop.f32.mrb[12].mxu1  ;;  %v1376_v26 = vld [vmem:[%s2038_s7 + $0x20] sm:$0xff]  }
 0x204   :  { %v1430_v32 = vpop.eup %1429  ;;  %v1805_v33 = vadd.f32 %v1784_v63, %v420_v31  ;;  %v1313_v34 = vpop.f32.mrb[13].mxu1  ;;  %v1378_v31 = vld [vmem:[%s2038_s7 + $0x28] sm:$0xff]  }
 0x205   :  { %1439 = vrcp.f32 %v467_v30  ;;  %v468_v35 = vadd.f32 1.0, %v1430_v32  ;;  %v423_v36 = vpop.f32.mrb[14].mxu1  ;;  %v1377_v30 = vld [vmem:[%s2038_s7 + $0x68] sm:$0xff]   ;;  %v1379_v32 = vld [vmem:[%s2038_s7 + $0x70] sm:$0xff]   ;;  %v1381_v34 = vld [vmem:[%s2038_s7 + $0x78] sm:$0xff]  }
 0x206   :  { %v1119_v37 = vmul.f32 -1.442695, %v1805_v33  ;;  %v1809_v38 = vadd.f32 %v1784_v63, %v423_v36  ;;  %v1314_v39 = vpop.f32.mrb[15].mxu1  ;;  %v538_v36 = vlaneseq }
 0x207   :  { %v1432_v40 = vpop.eup %1431  ;;  %1441 = vrcp.f32 %v468_v35  ;;  %v1382_v35 = vld [vmem:[%s2038_s7 + $0x38] sm:$0xff]   ;;  %v536_v39 = vld [vmem:[%s2041_s6] sm:$0x3] }
 0x208   :  { %v495_v41 = vmul.f32 %v1432_v40, %v397_v2  ;;  %1443 = vpow2.f32 %v1119_v37  ;;  %v1120_v42 = vmul.f32 -1.442695, %v1809_v38  ;;  %v539_v37 = vshrl.u32 %v538_v36, 7 }
 0x209   :  { %v1434_v43 = vpop.eup %1433 }
 0x20a   :  { %v1436_v44 = vpop.eup %1435  ;;  %505 = vst [vmem:[%s2040_s8] sm:$0xff] %v495_v41  ;;  %v496_v45 = vmul.f32 %v1434_v43, %v400_v6  ;;  %1445 = vpow2.f32 %v1120_v42  ;;  %v544_v40 = vsub.s32 1, %v539_v37 }
 0x20b   :  { %v469_v46 = vadd.f32 1.0, %v1436_v44  ;;  %v428_v47 = vpop.f32.mrb[16].mxu1 }
 0x20c   :  { %v1438_v48 = vpop.eup %1437  ;;  %506 = vst [vmem:[%s2040_s8 + $0x8] sm:$0xff] %v496_v45  ;;  %v515_v49 = vpack.c.bf16 %v496_v45, %v495_v41  ;;  %v429_v50 = vadd.f32 %v1784_v63, %v428_v47  ;;  %v1317_v51 = vpop.f32.mrb[17].mxu1  ;;  %v1901_v42 = vrot.slane %v536_v39, %v544_v40 }
 0x20d   :  { %1447 = vrcp.f32 %v469_v46  ;;  %v470_v0 = vadd.f32 1.0, %v1438_v48  ;;  %v431_v52 = vpop.f32.mrb[18].mxu1 }
 0x20e   :  { %v1121_v53 = vmul.f32 -1.442695, %v429_v50  ;;  %v432_v54 = vadd.f32 %v1784_v63, %v431_v52  ;;  %v1318_v55 = vpop.f32.mrb[19].mxu1  ;;  %661 = vmatmul.mubr.bf16.vlgmr.msra.gmra.mrb[20].mxu0 %v515_v49 }
 0x20f   :  { %v1440_v56 = vpop.eup %1439  ;;  %1449 = vrcp.f32 %v470_v0  ;;  %670 = vmatprep.mubr.bf16.mxu0 %v1545_v60 }
 0x210   :  { %v497_v57 = vmul.f32 %v1440_v56, %v1789_v10  ;;  %1451 = vpow2.f32 %v1121_v53  ;;  %v1122_v58 = vmul.f32 -1.442695, %v432_v54 }
 0x211   :  { %v1442_v59 = vpop.eup %1441 }
 0x212   :  { %v1444_v61 = vpop.eup %1443  ;;  %507 = vst [vmem:[%s2040_s8 + $0x10] sm:$0xff] %v497_v57  ;;  %v498_v62 = vmul.f32 %v1442_v59, %v1793_v14  ;;  %1453 = vpow2.f32 %v1122_v58 }
 0x213   :  { %v471_v63 = vadd.f32 1.0, %v1444_v61 }
 0x214   :  { %v1446_v1 = vpop.eup %1445  ;;  %508 = vst [vmem:[%s2040_s8 + $0x18] sm:$0xff] %v498_v62  ;;  %v516_v2 = vpack.c.bf16 %v498_v62, %v497_v57 }
 0x215   :  { %1455 = vrcp.f32 %v471_v63  ;;  %v472_v3 = vadd.f32 1.0, %v1446_v1 }
 0x216   :  { %671 = vmatmul.mubr.bf16.gmra.mrb[24].mxu0 %v516_v2 }
 0x217   :  { %v1448_v4 = vpop.eup %1447  ;;  %1457 = vrcp.f32 %v472_v3  ;;  %680 = vmatprep.mubr.bf16.mxu0 %v1545_v60 }
 0x218   :  { %v499_v5 = vmul.f32 %v1448_v4, %v1797_v21 }
 0x219   :  { %v1450_v6 = vpop.eup %1449 }
 0x21a   :  { %v1452_v7 = vpop.eup %1451  ;;  %509 = vst [vmem:[%s2040_s8 + $0x20] sm:$0xff] %v499_v5  ;;  %v500_v8 = vmul.f32 %v1450_v6, %v1801_v27  ;;  %v1373_v27 = vld [vmem:[%s2038_s7 + $0x58] sm:$0xff]  }
 0x21b   :  { %v473_v9 = vadd.f32 1.0, %v1452_v7 }
 0x21c   :  { %v1454_v10 = vpop.eup %1453  ;;  %510 = vst [vmem:[%s2040_s8 + $0x28] sm:$0xff] %v500_v8  ;;  %v517_v11 = vpack.c.bf16 %v500_v8, %v499_v5 }
 0x21d   :  { %1459 = vrcp.f32 %v473_v9  ;;  %v474_v12 = vadd.f32 1.0, %v1454_v10 }
 0x21e   :  { %681 = vmatmul.mubr.bf16.gmra.mrb[28].mxu0 %v517_v11 }
 0x21f   :  { %v1456_v13 = vpop.eup %1455  ;;  %1461 = vrcp.f32 %v474_v12  ;;  %690 = vmatprep.mubr.bf16.mxu0 %v1545_v60 }
 0x220   :  { %v501_v14 = vmul.f32 %v1456_v13, %v1805_v33  ;;  %v1380_v33 = vld [vmem:[%s2038_s7 + $0x30] sm:$0xff]  }
 0x221   :  { %v1458_v15 = vpop.eup %1457 }
 0x222   :  { %511 = vst [vmem:[%s2040_s8 + $0x30] sm:$0xff] %v501_v14  ;;  %v502_v16 = vmul.f32 %v1458_v15, %v1809_v38  ;;  %v540_v38 = vsub.s32 0, %v539_v37 }
 0x224   :  { %512 = vst [vmem:[%s2040_s8 + $0x38] sm:$0xff] %v502_v16  ;;  %v518_v17 = vpack.c.bf16 %v502_v16, %v501_v14  ;;  %v1899_v41 = vrot.slane %v536_v39, %v540_v38 }
 0x226   :  { %691 = vmatmul.mubr.bf16.gmra.mrb[32].mxu0 %v518_v17 }
 0x227   :  { %v1460_v18 = vpop.eup %1459  ;;  %700 = vmatprep.mubr.bf16.mxu0 %v1545_v60  ;;  %v1370_v60 = vld [vmem:[%s2038_s7 + $0x8] sm:$0xff]  }
 0x228   :  { %v503_v19 = vmul.f32 %v1460_v18, %v429_v50  ;;  %1204 = vmatpush3.bf16.msra.mxu1 %v1370_v60 }
 0x229   :  { %v1462_v20 = vpop.eup %1461  ;;  %1205 = vmatprep.subr.bf16.mxu1 %v1371_v24 }
 0x22a   :  { %513 = vst [vmem:[%s2040_s8 + $0x40] sm:$0xff] %v503_v19  ;;  %v504_v21 = vmul.f32 %v1462_v20, %v432_v54 }
 0x22c   :  { %514 = vst [vmem:[%s2040_s8 + $0x48] sm:$0xff] %v504_v21  ;;  %v519_v22 = vpack.c.bf16 %v504_v21, %v503_v19  ;;  %1206 = vmatpush3.bf16.msra.mxu1 %v1372_v25 }
 0x22d   :  { %1207 = vmatprep.subr.bf16.mxu1 %v1373_v27 }
 0x22e   :  { %701 = vmatmul.mubr.bf16.gmra.mrb[36].mxu0 %v519_v22 }
 0x230   :  { %1208 = vmatpush3.bf16.msra.mxu1 %v1374_v28 }
 0x231   :  { %1209 = vmatprep.subr.bf16.mxu1 %v1375_v29 }
 0x234   :  { %1210 = vmatpush3.bf16.msra.mxu1 %v1376_v26 }
 0x235   :  { %1211 = vmatprep.subr.bf16.mxu1 %v1377_v30 }
 0x238   :  { %1212 = vmatpush3.bf16.msra.mxu1 %v1378_v31 }
 0x239   :  { %1213 = vmatprep.subr.bf16.mxu1 %v1379_v32 }
 0x23c   :  { %1214 = vmatpush3.bf16.msra.mxu1 %v1380_v33 }
 0x23d   :  { %1215 = vmatprep.subr.bf16.mxu1 %v1381_v34 }
 0x240   :  { %1216 = vmatpush3.bf16.msra.mxu1 %v1382_v35 }
 0x2e1   :  { %v662_v43 = vpop.f32.mrb[20].mxu0 }
 0x2e2   :  { %v1904_v44 = vadd.f32 %v662_v43, %v1899_v41  ;;  %v664_v45 = vpop.f32.mrb[21].mxu0 }
 0x2e3   :  { %v1907_v46 = vadd.f32 %v664_v45, %v1901_v42  ;;  %v666_v47 = vpop.f32.mrb[22].mxu0 }
 0x2e4   :  { %v1139_v48 = vmul.f32 -1.442695, %v1904_v44  ;;  %v1911_v49 = vadd.f32 %v666_v47, %v1899_v41  ;;  %v668_v50 = vpop.f32.mrb[23].mxu0 }
 0x2e5   :  { %v1140_v51 = vmul.f32 -1.442695, %v1907_v46  ;;  %v1915_v0 = vadd.f32 %v668_v50, %v1901_v42 }
 0x2e6   :  { %1463 = vpow2.f32 %v1139_v48  ;;  %v1141_v52 = vmul.f32 -1.442695, %v1911_v49 }
 0x2e7   :  { %1465 = vpow2.f32 %v1140_v51  ;;  %v1142_v53 = vmul.f32 -1.442695, %v1915_v0 }
 0x2e8   :  { %1467 = vpow2.f32 %v1141_v52 }
 0x2e9   :  { %1469 = vpow2.f32 %v1142_v53  ;;  %v672_v54 = vpop.f32.mrb[24].mxu0 }
 0x2ea   :  { %v1920_v55 = vadd.f32 %v672_v54, %v1899_v41  ;;  %v674_v56 = vpop.f32.mrb[25].mxu0 }
 0x2eb   :  { %v1923_v57 = vadd.f32 %v674_v56, %v1901_v42  ;;  %v676_v58 = vpop.f32.mrb[26].mxu0 }
 0x2ec   :  { %v1143_v59 = vmul.f32 -1.442695, %v1920_v55  ;;  %v1927_v61 = vadd.f32 %v676_v58, %v1899_v41  ;;  %v678_v62 = vpop.f32.mrb[27].mxu0 }
 0x2ed   :  { %v1144_v63 = vmul.f32 -1.442695, %v1923_v57  ;;  %v1931_v1 = vadd.f32 %v678_v62, %v1901_v42 }
 0x2ee   :  { %1471 = vpow2.f32 %v1143_v59  ;;  %v1145_v2 = vmul.f32 -1.442695, %v1927_v61 }
 0x2ef   :  { %1473 = vpow2.f32 %v1144_v63  ;;  %v1146_v3 = vmul.f32 -1.442695, %v1931_v1 }
 0x2f0   :  { %v1464_v4 = vpop.eup %1463  ;;  %1475 = vpow2.f32 %v1145_v2 }
 0x2f1   :  { %v1466_v5 = vpop.eup %1465  ;;  %v771_v6 = vadd.f32 1.0, %v1464_v4  ;;  %1477 = vpow2.f32 %v1146_v3  ;;  %v682_v7 = vpop.f32.mrb[28].mxu0 }
 0x2f2   :  { %v1468_v8 = vpop.eup %1467  ;;  %v772_v9 = vadd.f32 1.0, %v1466_v5  ;;  %v1936_v10 = vadd.f32 %v682_v7, %v1899_v41  ;;  %v684_v11 = vpop.f32.mrb[29].mxu0 }
 0x2f3   :  { %v1470_v12 = vpop.eup %1469  ;;  %1479 = vrcp.f32 %v771_v6  ;;  %v773_v13 = vadd.f32 1.0, %v1468_v8  ;;  %v1939_v14 = vadd.f32 %v684_v11, %v1901_v42  ;;  %v686_v15 = vpop.f32.mrb[30].mxu0 }
 0x2f4   :  { %1481 = vrcp.f32 %v772_v9  ;;  %v774_v16 = vadd.f32 1.0, %v1470_v12  ;;  %v1147_v17 = vmul.f32 -1.442695, %v1936_v10  ;;  %v1943_v18 = vadd.f32 %v686_v15, %v1899_v41  ;;  %v688_v19 = vpop.f32.mrb[31].mxu0 }
 0x2f5   :  { %1483 = vrcp.f32 %v773_v13  ;;  %v1148_v20 = vmul.f32 -1.442695, %v1939_v14  ;;  %v1947_v21 = vadd.f32 %v688_v19, %v1901_v42 }
 0x2f6   :  { %1485 = vrcp.f32 %v774_v16  ;;  %v1149_v22 = vmul.f32 -1.442695, %v1943_v18 }
 0x2f7   :  { %1487 = vpow2.f32 %v1147_v17  ;;  %v1150_v23 = vmul.f32 -1.442695, %v1947_v21 }
 0x2f8   :  { %v1472_v60 = vpop.eup %1471  ;;  %1489 = vpow2.f32 %v1148_v20 }
 0x2f9   :  { %v1474_v24 = vpop.eup %1473  ;;  %v775_v25 = vadd.f32 1.0, %v1472_v60  ;;  %1491 = vpow2.f32 %v1149_v22  ;;  %v692_v27 = vpop.f32.mrb[32].mxu0 }
 0x2fa   :  { %v1476_v28 = vpop.eup %1475  ;;  %v776_v29 = vadd.f32 1.0, %v1474_v24  ;;  %1493 = vpow2.f32 %v1150_v23  ;;  %v1952_v26 = vadd.f32 %v692_v27, %v1899_v41  ;;  %v694_v30 = vpop.f32.mrb[33].mxu0 }
 0x2fb   :  { %v1478_v31 = vpop.eup %1477  ;;  %1495 = vrcp.f32 %v775_v25  ;;  %v777_v32 = vadd.f32 1.0, %v1476_v28  ;;  %v1955_v33 = vadd.f32 %v694_v30, %v1901_v42  ;;  %v696_v34 = vpop.f32.mrb[34].mxu0 }
 0x2fc   :  { %1497 = vrcp.f32 %v776_v29  ;;  %v778_v35 = vadd.f32 1.0, %v1478_v31  ;;  %v1151_v36 = vmul.f32 -1.442695, %v1952_v26  ;;  %v1959_v37 = vadd.f32 %v696_v34, %v1899_v41  ;;  %v698_v38 = vpop.f32.mrb[35].mxu0 }
 0x2fd   :  { %v1480_v39 = vpop.eup %1479  ;;  %1499 = vrcp.f32 %v777_v32  ;;  %v1152_v40 = vmul.f32 -1.442695, %v1955_v33  ;;  %v1963_v43 = vadd.f32 %v698_v38, %v1901_v42 }
 0x2fe   :  { %v1482_v45 = vpop.eup %1481  ;;  %1501 = vrcp.f32 %v778_v35  ;;  %v1153_v47 = vmul.f32 -1.442695, %v1959_v37  ;;  %v831_v52 = vmul.f32 %v1480_v39, %v1904_v44 }
 0x2ff   :  { %v1484_v48 = vpop.eup %1483  ;;  %1503 = vpow2.f32 %v1151_v36  ;;  %v1154_v50 = vmul.f32 -1.442695, %v1963_v43  ;;  %v832_v56 = vmul.f32 %v1482_v45, %v1907_v46 }
 0x300   :  { %v1486_v51 = vpop.eup %1485  ;;  %v833_v53 = vmul.f32 %v1484_v48, %v1911_v49  ;;  %1505 = vpow2.f32 %v1152_v40 }
 0x301   :  { %v1488_v54 = vpop.eup %1487  ;;  %v834_v58 = vmul.f32 %v1486_v51, %v1915_v0  ;;  %1507 = vpow2.f32 %v1153_v47  ;;  %v702_v59 = vpop.f32.mrb[36].mxu0 }
 0x302   :  { %v1490_v62 = vpop.eup %1489  ;;  %v851_v63 = vpack.c.bf16 %v833_v53, %v831_v52  ;;  %v779_v2 = vadd.f32 1.0, %v1488_v54  ;;  %1509 = vpow2.f32 %v1154_v50  ;;  %v1972_v3 = vadd.f32 %v702_v59, %v1899_v41  ;;  %v704_v4 = vpop.f32.mrb[37].mxu0 }
 0x303   :  { %v1492_v5 = vpop.eup %1491  ;;  %v780_v44 = vadd.f32 1.0, %v1490_v62  ;;  %v1975_v49 = vadd.f32 %v704_v4, %v1901_v42  ;;  %v706_v6 = vpop.f32.mrb[38].mxu0  ;;  %v852_v7 = vpack.c.bf16 %v834_v58, %v832_v56 }
 0x304   :  { %v1494_v46 = vpop.eup %1493  ;;  %1511 = vrcp.f32 %v779_v2  ;;  %v781_v0 = vadd.f32 1.0, %v1492_v5  ;;  %v1155_v8 = vmul.f32 -1.442695, %v1972_v3  ;;  %v1979_v9 = vadd.f32 %v706_v6, %v1899_v41  ;;  %v708_v11 = vpop.f32.mrb[39].mxu0 }
 0x305   :  { %v1496_v12 = vpop.eup %1495  ;;  %1513 = vrcp.f32 %v780_v44  ;;  %v782_v13 = vadd.f32 1.0, %v1494_v46  ;;  %v1156_v15 = vmul.f32 -1.442695, %v1975_v49  ;;  %v1983_v16 = vadd.f32 %v708_v11, %v1901_v42  ;;  %1021 = vmatprep.mubr.bf16.mxu1 %v852_v7 }
 0x306   :  { %v1498_v17 = vpop.eup %1497  ;;  %1515 = vrcp.f32 %v781_v0  ;;  %v1157_v19 = vmul.f32 -1.442695, %v1979_v9  ;;  %1022 = vmatmul.mubr.bf16.vlgmr.msra.gmra.mrb[20].mxu1 %v851_v63  ;;  %v835_v23 = vmul.f32 %v1496_v12, %v1920_v55 }
 0x307   :  { %v1500_v20 = vpop.eup %1499  ;;  %1517 = vrcp.f32 %v782_v13  ;;  %v1158_v41 = vmul.f32 -1.442695, %v1983_v16  ;;  %v836_v42 = vmul.f32 %v1498_v17, %v1923_v57 }
 0x308   :  { %v1502_v22 = vpop.eup %1501  ;;  %v837_v60 = vmul.f32 %v1500_v20, %v1927_v61  ;;  %1519 = vpow2.f32 %v1155_v8 }
 0x309   :  { %v1504_v24 = vpop.eup %1503  ;;  %v838_v25 = vmul.f32 %v1502_v22, %v1931_v1  ;;  %1521 = vpow2.f32 %v1156_v15 }
 0x30a   :  { %v1506_v27 = vpop.eup %1505  ;;  %v783_v28 = vadd.f32 1.0, %v1504_v24  ;;  %1523 = vpow2.f32 %v1157_v19  ;;  %v853_v29 = vpack.c.bf16 %v837_v60, %v835_v23 }
 0x30b   :  { %v1508_v30 = vpop.eup %1507  ;;  %v784_v31 = vadd.f32 1.0, %v1506_v27  ;;  %1525 = vpow2.f32 %v1158_v41  ;;  %v854_v32 = vpack.c.bf16 %v838_v25, %v836_v42 }
 0x30c   :  { %v1510_v34 = vpop.eup %1509  ;;  %1527 = vrcp.f32 %v783_v28  ;;  %v785_v55 = vadd.f32 1.0, %v1508_v30 }
 0x30d   :  { %1529 = vrcp.f32 %v784_v31  ;;  %v786_v61 = vadd.f32 1.0, %v1510_v34  ;;  %1029 = vmatprep.mubr.bf16.mxu1 %v854_v32 }
 0x30e   :  { %v1512_v35 = vpop.eup %1511  ;;  %1531 = vrcp.f32 %v785_v55  ;;  %1030 = vmatmul.mubr.bf16.gmra.mrb[24].mxu1 %v853_v29 }
 0x30f   :  { %v1514_v57 = vpop.eup %1513  ;;  %1533 = vrcp.f32 %v786_v61  ;;  %v839_v38 = vmul.f32 %v1512_v35, %v1936_v10 }
 0x310   :  { %v1516_v1 = vpop.eup %1515  ;;  %v840_v45 = vmul.f32 %v1514_v57, %v1939_v14 }
 0x311   :  { %v1518_v36 = vpop.eup %1517  ;;  %v841_v39 = vmul.f32 %v1516_v1, %v1943_v18 }
 0x312   :  { %v1520_v40 = vpop.eup %1519  ;;  %v842_v47 = vmul.f32 %v1518_v36, %v1947_v21 }
 0x313   :  { %v1522_v48 = vpop.eup %1521  ;;  %v787_v50 = vadd.f32 1.0, %v1520_v40  ;;  %v855_v51 = vpack.c.bf16 %v841_v39, %v839_v38 }
 0x314   :  { %v1524_v52 = vpop.eup %1523  ;;  %v788_v53 = vadd.f32 1.0, %v1522_v48  ;;  %v856_v54 = vpack.c.bf16 %v842_v47, %v840_v45 }
 0x315   :  { %v1526_v56 = vpop.eup %1525  ;;  %1535 = vrcp.f32 %v787_v50  ;;  %v789_v58 = vadd.f32 1.0, %v1524_v52 }
 0x316   :  { %v1528_v59 = vpop.eup %1527  ;;  %1537 = vrcp.f32 %v788_v53  ;;  %v790_v62 = vadd.f32 1.0, %v1526_v56  ;;  %1037 = vmatprep.mubr.bf16.mxu1 %v856_v54 }
 0x317   :  { %v1530_v10 = vpop.eup %1529  ;;  %1539 = vrcp.f32 %v789_v58  ;;  %1038 = vmatmul.mubr.bf16.gmra.mrb[28].mxu1 %v855_v51  ;;  %v843_v21 = vmul.f32 %v1528_v59, %v1952_v26 }
 0x318   :  { %v1532_v18 = vpop.eup %1531  ;;  %1541 = vrcp.f32 %v790_v62  ;;  %v844_v2 = vmul.f32 %v1530_v10, %v1955_v33 }
 0x319   :  { %v1534_v14 = vpop.eup %1533  ;;  %v845_v63 = vmul.f32 %v1532_v18, %v1959_v37 }
 0x31a   :  { %v846_v4 = vmul.f32 %v1534_v14, %v1963_v43 }
 0x31b   :  { %v857_v5 = vpack.c.bf16 %v845_v63, %v843_v21 }
 0x31c   :  { %v858_v44 = vpack.c.bf16 %v846_v4, %v844_v2 }
 0x31e   :  { %1045 = vmatprep.mubr.bf16.mxu1 %v858_v44 }
 0x31f   :  { %v1536_v6 = vpop.eup %1535  ;;  %1046 = vmatmul.mubr.bf16.gmra.mrb[32].mxu1 %v857_v5 }
 0x320   :  { %v1538_v7 = vpop.eup %1537  ;;  %v847_v8 = vmul.f32 %v1536_v6, %v1972_v3 }
 0x321   :  { %v1540_v46 = vpop.eup %1539  ;;  %v848_v26 = vmul.f32 %v1538_v7, %v1975_v49 }
 0x322   :  { %v1542_v0 = vpop.eup %1541  ;;  %v849_v11 = vmul.f32 %v1540_v46, %v1979_v9 }
 0x323   :  { %v850_v37 = vmul.f32 %v1542_v0, %v1983_v16 }
 0x324   :  { %v859_v12 = vpack.c.bf16 %v849_v11, %v847_v8 }
 0x325   :  { %v860_v33 = vpack.c.bf16 %v850_v37, %v848_v26 }
 0x327   :  { %1053 = vmatprep.mubr.bf16.mxu1 %v860_v33 }
 0x328   :  { %1054 = vmatmul.mubr.bf16.gmra.mrb[36].mxu1 %v859_v12 }
 0x3d9   :  { %v1217_v43 = vpop.f32.mrb[20].mxu1 }
 0x3da   :  { %v1218_v13 = vpop.f32.mrb[21].mxu1 }
 0x3db   :  { %v1219_v15 = vadd.f32 %v1218_v13, %v1217_v43  ;;  %v1220_v17 = vpop.f32.mrb[22].mxu1 }
 0x3dc   :  { %v1221_v19 = vpop.f32.mrb[23].mxu1 }
 0x3dd   :  { %1062 = vst [vmem:[%s2042_s9] sm:$0xff] %v1219_v15  ;;  %v1222_v3 = vadd.f32 %v1221_v19, %v1220_v17 }
 0x3df   :  { %1063 = vst [vmem:[%s2042_s9 + $0x8] sm:$0xff] %v1222_v3 }
 0x3e1   :  { %v1223_v49 = vpop.f32.mrb[24].mxu1 }
 0x3e2   :  { %v1224_v9 = vpop.f32.mrb[25].mxu1 }
 0x3e3   :  { %v1225_v16 = vadd.f32 %v1224_v9, %v1223_v49  ;;  %v1226_v20 = vpop.f32.mrb[26].mxu1 }
 0x3e4   :  { %v1227_v41 = vpop.f32.mrb[27].mxu1 }
 0x3e5   :  { %1064 = vst [vmem:[%s2042_s9 + $0x10] sm:$0xff] %v1225_v16  ;;  %v1228_v22 = vadd.f32 %v1227_v41, %v1226_v20 }
 0x3e7   :  { %1065 = vst [vmem:[%s2042_s9 + $0x18] sm:$0xff] %v1228_v22 }
 0x3ea   :  { %v1229_v23 = vpop.f32.mrb[28].mxu1 }
 0x3eb   :  { %v1230_v60 = vpop.f32.mrb[29].mxu1 }
 0x3ec   :  { %v1231_v24 = vadd.f32 %v1230_v60, %v1229_v23  ;;  %v1232_v42 = vpop.f32.mrb[30].mxu1 }
 0x3ed   :  { %v1233_v25 = vpop.f32.mrb[31].mxu1 }
 0x3ee   :  { %1066 = vst [vmem:[%s2042_s9 + $0x20] sm:$0xff] %v1231_v24  ;;  %v1234_v27 = vadd.f32 %v1233_v25, %v1232_v42 }
 0x3f0   :  { %1067 = vst [vmem:[%s2042_s9 + $0x28] sm:$0xff] %v1234_v27 }
 0x3f2   :  { %v1235_v28 = vpop.f32.mrb[32].mxu1 }
 0x3f3   :  { %v1236_v29 = vpop.f32.mrb[33].mxu1 }
 0x3f4   :  { %v1237_v30 = vadd.f32 %v1236_v29, %v1235_v28  ;;  %v1238_v31 = vpop.f32.mrb[34].mxu1 }
 0x3f5   :  { %v1239_v32 = vpop.f32.mrb[35].mxu1 }
 0x3f6   :  { %1068 = vst [vmem:[%s2042_s9 + $0x30] sm:$0xff] %v1237_v30  ;;  %v1240_v34 = vadd.f32 %v1239_v32, %v1238_v31 }
 0x3f8   :  { %1069 = vst [vmem:[%s2042_s9 + $0x38] sm:$0xff] %v1240_v34 }
 0x3fb   :  { %v1241_v55 = vpop.f32.mrb[36].mxu1 }
 0x3fc   :  { %v1242_v61 = vpop.f32.mrb[37].mxu1 }
 0x3fd   :  { %v1243_v35 = vadd.f32 %v1242_v61, %v1241_v55  ;;  %v1244_v57 = vpop.f32.mrb[38].mxu1 }
 0x3fe   :  { %v1245_v1 = vpop.f32.mrb[39].mxu1 }
 0x3ff   :  { %1070 = vst [vmem:[%s2042_s9 + $0x40] sm:$0xff] %v1243_v35  ;;  %v1246_v36 = vadd.f32 %v1245_v1, %v1244_v57 }
 0x401   :  { %1071 = vst [vmem:[%s2042_s9 + $0x48] sm:$0xff] %v1246_v36 }

// kernel: e_gcl_vel_forward.4
= control target key start
LH: loop header
LB: loop body
LE: loop exit
PB: predicated region body
PF: predicated region fallthrough
CT: control target
= control target key end

     0   :  { %v1141_v1 = vmov 0.0   ;;  %vm1142_vm0 = vmmov 0   ;;  %s1393_s0 = inlined_call_operand.vmem [shape: bf16[40,128], index: 0, kind: input, shape index: {}]   ;;  %s1394_s1 = inlined_call_operand.vmem [shape: bf16[128,128], index: 1, kind: input, shape index: {}]   ;;  %s1395_s2 = inlined_call_operand.vmem [shape: f32[1,128], index: 2, kind: input, shape index: {}]   ;;  %s1396_s3 = inlined_call_operand.vmem [shape: bf16[128,128], index: 3, kind: input, shape index: {}]   ;;  %s1397_s4 = inlined_call_operand.vmem [shape: f32[1,128], index: 4, kind: input, shape index: {}]   ;;  %s1398_s5 = inlined_call_operand.vmem [shape: bf16[128,128], index: 5, kind: input, shape index: {}]   ;;  %s1399_s6 = inlined_call_operand.vmem [shape: f32[1,128], index: 6, kind: input, shape index: {}]   ;;  %s1400_s7 = inlined_call_operand.vmem [shape: bf16[128,128], index: 7, kind: input, shape index: {}]   ;;  %s1401_s8 = inlined_call_operand.vmem [shape: f32[40,128], index: 8, kind: output, shape index: {0}]   ;;  %s1402_s9 = inlined_call_operand.vmem [shape: f32[40,128], index: 9, kind: output, shape index: {1}]  }
   0x1   :  { %v1034_v0 = vld [vmem:[%s1394_s1] sm:$0xff]   ;;  %920 = vmatprep.subr.bf16.mxu0 %v1141_v1  ;;  %948 = vmatprep.subr.bf16.mxu1 %v1141_v1  ;;  %v1035_v2 = vld [vmem:[%s1394_s1 + $0x8] sm:$0xff]   ;;  %v1036_v3 = vld [vmem:[%s1394_s1 + $0x10] sm:$0xff]  }
   0x2   :  { %921 = vmatpush3.bf16.msra.mxu0 %v1034_v0  ;;  %936 = vmatprep.mubr.msk.bf16.mxu0 %vm1142_vm0, %v1141_v1  ;;  %v1037_v4 = vld [vmem:[%s1394_s1 + $0x18] sm:$0xff]   ;;  %v1038_v5 = vld [vmem:[%s1394_s1 + $0x20] sm:$0xff]   ;;  %v1039_v6 = vld [vmem:[%s1394_s1 + $0x28] sm:$0xff]  }
   0x3   :  { %922 = vmatprep.subr.bf16.mxu0 %v1141_v1  ;;  %964 = vmatprep.mubr.msk.bf16.mxu1 %vm1142_vm0, %v1141_v1  ;;  %v1040_v7 = vld [vmem:[%s1394_s1 + $0x30] sm:$0xff]   ;;  %v1041_v8 = vld [vmem:[%s1394_s1 + $0x38] sm:$0xff]   ;;  %v1042_v9 = vld [vmem:[%s1393_s0] sm:$0xff]  }
   0x4   :  { %v1043_v10 = vld [vmem:[%s1393_s0 + $0x8] sm:$0xff]   ;;  %v1044_v11 = vld [vmem:[%s1393_s0 + $0x10] sm:$0xff]   ;;  %v1045_v12 = vld [vmem:[%s1396_s3] sm:$0xff]  }
   0x5   :  { %949 = vmatpush3.bf16.msra.mxu1 %v1045_v12  ;;  %v1046_v13 = vld [vmem:[%s1396_s3 + $0x8] sm:$0xff]   ;;  %v1047_v14 = vld [vmem:[%s1396_s3 + $0x10] sm:$0xff]   ;;  %v1048_v15 = vld [vmem:[%s1396_s3 + $0x18] sm:$0xff]  }
   0x6   :  { %923 = vmatpush3.bf16.msra.mxu0 %v1035_v2  ;;  %950 = vmatprep.subr.bf16.mxu1 %v1141_v1  ;;  %v1049_v16 = vld [vmem:[%s1396_s3 + $0x20] sm:$0xff]   ;;  %v1050_v17 = vld [vmem:[%s1396_s3 + $0x28] sm:$0xff]   ;;  %v1051_v18 = vld [vmem:[%s1396_s3 + $0x30] sm:$0xff]  }
   0x7   :  { %924 = vmatprep.subr.bf16.mxu0 %v1141_v1  ;;  %v1052_v19 = vld [vmem:[%s1396_s3 + $0x38] sm:$0xff]   ;;  %v820_v20 = vld [vmem:[%s1395_s2] ss:$0 sm:$0xff] }
   0x8   :  { %v1056_v12 = vld [vmem:[%s1398_s5 + $0x18] sm:$0xff]  }
   0x9   :  { %951 = vmatpush3.bf16.msra.mxu1 %v1046_v13  ;;  %v1057_v13 = vld [vmem:[%s1398_s5 + $0x20] sm:$0xff]  }
   0xa   :  { %925 = vmatpush3.bf16.msra.mxu0 %v1036_v3  ;;  %952 = vmatprep.subr.bf16.mxu1 %v1141_v1 }
   0xb   :  { %926 = vmatprep.subr.bf16.mxu0 %v1141_v1 }
   0xd   :  { %953 = vmatpush3.bf16.msra.mxu1 %v1047_v14  ;;  %v1058_v14 = vld [vmem:[%s1398_s5 + $0x28] sm:$0xff]  }
   0xe   :  { %927 = vmatpush3.bf16.msra.mxu0 %v1037_v4  ;;  %954 = vmatprep.subr.bf16.mxu1 %v1141_v1 }
   0xf   :  { %928 = vmatprep.subr.bf16.mxu0 %v1141_v1 }
  0x11   :  { %955 = vmatpush3.bf16.msra.mxu1 %v1048_v15  ;;  %v1059_v15 = vld [vmem:[%s1398_s5 + $0x30] sm:$0xff]  }
  0x12   :  { %929 = vmatpush3.bf16.msra.mxu0 %v1038_v5  ;;  %956 = vmatprep.subr.bf16.mxu1 %v1141_v1 }
  0x13   :  { %930 = vmatprep.subr.bf16.mxu0 %v1141_v1 }
  0x15   :  { %957 = vmatpush3.bf16.msra.mxu1 %v1049_v16  ;;  %v1060_v16 = vld [vmem:[%s1398_s5 + $0x38] sm:$0xff]  }
  0x16   :  { %931 = vmatpush3.bf16.msra.mxu0 %v1039_v6  ;;  %958 = vmatprep.subr.bf16.mxu1 %v1141_v1 }
  0x17   :  { %932 = vmatprep.subr.bf16.mxu0 %v1141_v1 }
  0x19   :  { %959 = vmatpush3.bf16.msra.mxu1 %v1050_v17  ;;  %v838_v17 = vld [vmem:[%s1397_s4] ss:$0 sm:$0xff] }
  0x1a   :  { %933 = vmatpush3.bf16.msra.mxu0 %v1040_v7  ;;  %960 = vmatprep.subr.bf16.mxu1 %v1141_v1 }
  0x1b   :  { %934 = vmatprep.subr.bf16.mxu0 %v1141_v1 }
  0x1d   :  { %961 = vmatpush3.bf16.msra.mxu1 %v1051_v18 }
  0x1e   :  { %935 = vmatpush3.bf16.msra.mxu0 %v1041_v8  ;;  %962 = vmatprep.subr.bf16.mxu1 %v1141_v1 }
  0x1f   :  { %976 = vmatprep.subr.bf16.mxu0 %v1141_v1 }
  0x21   :  { %937 = vmatmul.mubr.bf16.vlgmr.msra.gmra.mrb[0].mxu0 %v1042_v9  ;;  %963 = vmatpush3.bf16.msra.mxu1 %v1052_v19  ;;  %v1053_v9 = vld [vmem:[%s1398_s5] sm:$0xff]  }
  0x22   :  { %940 = vmatprep.mubr.msk.bf16.mxu0 %vm1142_vm0, %v1141_v1  ;;  %1004 = vmatprep.subr.bf16.mxu1 %v1141_v1 }
  0x23   :  { %977 = vmatpush3.bf16.msra.mxu0 %v1053_v9  ;;  %v1064_v9 = vld [vmem:[%s1400_s7 + $0x18] sm:$0xff]  }
  0x24   :  { %978 = vmatprep.subr.bf16.mxu0 %v1141_v1 }
  0x29   :  { %941 = vmatmul.mubr.bf16.gmra.mrb[4].mxu0 %v1043_v10  ;;  %v1054_v10 = vld [vmem:[%s1398_s5 + $0x8] sm:$0xff]  }
  0x2a   :  { %944 = vmatprep.mubr.msk.bf16.mxu0 %vm1142_vm0, %v1141_v1  ;;  %979 = vmatpush3.bf16.msra.mxu0 %v1054_v10  ;;  %v1065_v10 = vld [vmem:[%s1400_s7 + $0x20] sm:$0xff]  }
  0x2b   :  { %980 = vmatprep.subr.bf16.mxu0 %v1141_v1 }
  0x31   :  { %945 = vmatmul.mubr.bf16.gmra.mrb[8].mxu0 %v1044_v11  ;;  %v1055_v11 = vld [vmem:[%s1398_s5 + $0x10] sm:$0xff]  }
  0x32   :  { %992 = vmatprep.mubr.msk.bf16.mxu0 %vm1142_vm0, %v1141_v1  ;;  %981 = vmatpush3.bf16.msra.mxu0 %v1055_v11  ;;  %v1066_v11 = vld [vmem:[%s1400_s7 + $0x28] sm:$0xff]  }
  0x33   :  { %982 = vmatprep.subr.bf16.mxu0 %v1141_v1 }
  0x36   :  { %983 = vmatpush3.bf16.msra.mxu0 %v1056_v12  ;;  %v1067_v12 = vld [vmem:[%s1400_s7 + $0x30] sm:$0xff]  }
  0x37   :  { %984 = vmatprep.subr.bf16.mxu0 %v1141_v1 }
  0x3a   :  { %985 = vmatpush3.bf16.msra.mxu0 %v1057_v13  ;;  %v1068_v13 = vld [vmem:[%s1400_s7 + $0x38] sm:$0xff]  }
  0x3b   :  { %986 = vmatprep.subr.bf16.mxu0 %v1141_v1 }
  0x3e   :  { %987 = vmatpush3.bf16.msra.mxu0 %v1058_v14  ;;  %v853_v14 = vld [vmem:[%s1399_s6] ss:$0 sm:$0xff] }
  0x3f   :  { %988 = vmatprep.subr.bf16.mxu0 %v1141_v1 }
  0x42   :  { %989 = vmatpush3.bf16.msra.mxu0 %v1059_v15 }
  0x43   :  { %990 = vmatprep.subr.bf16.mxu0 %v1141_v1 }
  0x46   :  { %991 = vmatpush3.bf16.msra.mxu0 %v1060_v16 }
  0xf4   :  { %v161_v21 = vpop.f32.mrb[0].mxu0 }
  0xf5   :  { %v162_v22 = vadd.f32 %v820_v20, %v161_v21  ;;  %v938_v23 = vpop.f32.mrb[1].mxu0 }
  0xf6   :  { %v164_v24 = vpop.f32.mrb[2].mxu0 }
  0xf7   :  { %v832_v25 = vmul.f32 -1.442695, %v162_v22  ;;  %v165_v26 = vadd.f32 %v820_v20, %v164_v24  ;;  %v939_v27 = vpop.f32.mrb[3].mxu0 }
  0xf9   :  { %1069 = vpow2.f32 %v832_v25  ;;  %v833_v28 = vmul.f32 -1.442695, %v165_v26 }
  0xfb   :  { %1071 = vpow2.f32 %v833_v28 }
  0xfc   :  { %v169_v29 = vpop.f32.mrb[4].mxu0 }
  0xfd   :  { %v170_v30 = vadd.f32 %v820_v20, %v169_v29  ;;  %v942_v31 = vpop.f32.mrb[5].mxu0 }
  0xfe   :  { %v172_v32 = vpop.f32.mrb[6].mxu0 }
  0xff   :  { %v834_v33 = vmul.f32 -1.442695, %v170_v30  ;;  %v173_v34 = vadd.f32 %v820_v20, %v172_v32  ;;  %v943_v35 = vpop.f32.mrb[7].mxu0 }
 0x101   :  { %1073 = vpow2.f32 %v834_v33  ;;  %v835_v36 = vmul.f32 -1.442695, %v173_v34 }
 0x103   :  { %v1070_v37 = vpop.eup %1069  ;;  %1075 = vpow2.f32 %v835_v36 }
 0x104   :  { %v202_v38 = vadd.f32 1.0, %v1070_v37  ;;  %v177_v39 = vpop.f32.mrb[8].mxu0 }
 0x105   :  { %v1072_v40 = vpop.eup %1071  ;;  %v178_v41 = vadd.f32 %v820_v20, %v177_v39  ;;  %v946_v42 = vpop.f32.mrb[9].mxu0 }
 0x106   :  { %1077 = vrcp.f32 %v202_v38  ;;  %v203_v43 = vadd.f32 1.0, %v1072_v40  ;;  %v180_v44 = vpop.f32.mrb[10].mxu0 }
 0x107   :  { %v836_v45 = vmul.f32 -1.442695, %v178_v41  ;;  %v181_v46 = vadd.f32 %v820_v20, %v180_v44  ;;  %v947_v47 = vpop.f32.mrb[11].mxu0 }
 0x108   :  { %1079 = vrcp.f32 %v203_v43 }
 0x109   :  { %1081 = vpow2.f32 %v836_v45  ;;  %v837_v48 = vmul.f32 -1.442695, %v181_v46 }
 0x10b   :  { %v1074_v49 = vpop.eup %1073  ;;  %1083 = vpow2.f32 %v837_v48 }
 0x10c   :  { %v204_v50 = vadd.f32 1.0, %v1074_v49 }
 0x10d   :  { %v1076_v51 = vpop.eup %1075 }
 0x10e   :  { %1085 = vrcp.f32 %v204_v50  ;;  %v205_v52 = vadd.f32 1.0, %v1076_v51 }
 0x110   :  { %v1078_v53 = vpop.eup %1077  ;;  %1087 = vrcp.f32 %v205_v52 }
 0x111   :  { %v220_v56 = vmul.f32 %v1078_v53, %v162_v22 }
 0x112   :  { %v1080_v54 = vpop.eup %1079 }
 0x113   :  { %v1082_v55 = vpop.eup %1081  ;;  %v221_v57 = vmul.f32 %v1080_v54, %v165_v26 }
 0x114   :  { %v206_v58 = vadd.f32 1.0, %v1082_v55 }
 0x115   :  { %v1084_v59 = vpop.eup %1083  ;;  %v226_v60 = vpack.c.bf16 %v221_v57, %v220_v56 }
 0x116   :  { %1089 = vrcp.f32 %v206_v58  ;;  %v207_v61 = vadd.f32 1.0, %v1084_v59 }
 0x117   :  { %965 = vmatmul.mubr.bf16.vlgmr.msra.gmra.mrb[0].mxu1 %v226_v60 }
 0x118   :  { %v1086_v62 = vpop.eup %1085  ;;  %1091 = vrcp.f32 %v207_v61  ;;  %968 = vmatprep.mubr.msk.bf16.mxu1 %vm1142_vm0, %v1141_v1 }
 0x119   :  { %v222_v0 = vmul.f32 %v1086_v62, %v170_v30 }
 0x11a   :  { %v1088_v63 = vpop.eup %1087 }
 0x11b   :  { %v223_v2 = vmul.f32 %v1088_v63, %v173_v34 }
 0x11d   :  { %v227_v3 = vpack.c.bf16 %v223_v2, %v222_v0 }
 0x11f   :  { %969 = vmatmul.mubr.bf16.gmra.mrb[4].mxu1 %v227_v3 }
 0x120   :  { %v1090_v4 = vpop.eup %1089  ;;  %972 = vmatprep.mubr.msk.bf16.mxu1 %vm1142_vm0, %v1141_v1 }
 0x121   :  { %v224_v6 = vmul.f32 %v1090_v4, %v178_v41 }
 0x122   :  { %v1092_v5 = vpop.eup %1091 }
 0x123   :  { %v225_v7 = vmul.f32 %v1092_v5, %v181_v46 }
 0x125   :  { %v228_v8 = vpack.c.bf16 %v225_v7, %v224_v6  ;;  %v1061_v6 = vld [vmem:[%s1400_s7] sm:$0xff]   ;;  %v1062_v7 = vld [vmem:[%s1400_s7 + $0x8] sm:$0xff]  }
 0x126   :  { %1005 = vmatpush3.bf16.msra.mxu1 %v1061_v6 }
 0x127   :  { %973 = vmatmul.mubr.bf16.gmra.mrb[8].mxu1 %v228_v8  ;;  %1006 = vmatprep.subr.bf16.mxu1 %v1141_v1  ;;  %v1063_v8 = vld [vmem:[%s1400_s7 + $0x10] sm:$0xff]  }
 0x128   :  { %1020 = vmatprep.mubr.msk.bf16.mxu1 %vm1142_vm0, %v1141_v1 }
 0x12a   :  { %1007 = vmatpush3.bf16.msra.mxu1 %v1062_v7 }
 0x12b   :  { %1008 = vmatprep.subr.bf16.mxu1 %v1141_v1 }
 0x12e   :  { %1009 = vmatpush3.bf16.msra.mxu1 %v1063_v8 }
 0x12f   :  { %1010 = vmatprep.subr.bf16.mxu1 %v1141_v1 }
 0x132   :  { %1011 = vmatpush3.bf16.msra.mxu1 %v1064_v9 }
 0x133   :  { %1012 = vmatprep.subr.bf16.mxu1 %v1141_v1 }
 0x136   :  { %1013 = vmatpush3.bf16.msra.mxu1 %v1065_v10 }
 0x137   :  { %1014 = vmatprep.subr.bf16.mxu1 %v1141_v1 }
 0x13a   :  { %1015 = vmatpush3.bf16.msra.mxu1 %v1066_v11 }
 0x13b   :  { %1016 = vmatprep.subr.bf16.mxu1 %v1141_v1 }
 0x13e   :  { %1017 = vmatpush3.bf16.msra.mxu1 %v1067_v12 }
 0x13f   :  { %1018 = vmatprep.subr.bf16.mxu1 %v1141_v1 }
 0x142   :  { %1019 = vmatpush3.bf16.msra.mxu1 %v1068_v13 }
 0x1ea   :  { %v334_v18 = vpop.f32.mrb[0].mxu1 }
 0x1eb   :  { %v335_v19 = vadd.f32 %v838_v17, %v334_v18  ;;  %v966_v20 = vpop.f32.mrb[1].mxu1 }
 0x1ec   :  { %v337_v21 = vpop.f32.mrb[2].mxu1 }
 0x1ed   :  { %v847_v22 = vmul.f32 -1.442695, %v335_v19  ;;  %v338_v23 = vadd.f32 %v838_v17, %v337_v21  ;;  %v967_v24 = vpop.f32.mrb[3].mxu1 }
 0x1ef   :  { %1093 = vpow2.f32 %v847_v22  ;;  %v848_v25 = vmul.f32 -1.442695, %v338_v23 }
 0x1f1   :  { %1095 = vpow2.f32 %v848_v25 }
 0x1f2   :  { %v342_v26 = vpop.f32.mrb[4].mxu1 }
 0x1f3   :  { %v343_v27 = vadd.f32 %v838_v17, %v342_v26  ;;  %v970_v28 = vpop.f32.mrb[5].mxu1 }
 0x1f4   :  { %v345_v29 = vpop.f32.mrb[6].mxu1 }
 0x1f5   :  { %v849_v30 = vmul.f32 -1.442695, %v343_v27  ;;  %v346_v31 = vadd.f32 %v838_v17, %v345_v29  ;;  %v971_v32 = vpop.f32.mrb[7].mxu1 }
 0x1f7   :  { %1097 = vpow2.f32 %v849_v30  ;;  %v850_v33 = vmul.f32 -1.442695, %v346_v31 }
 0x1f9   :  { %v1094_v34 = vpop.eup %1093  ;;  %1099 = vpow2.f32 %v850_v33 }
 0x1fa   :  { %v375_v35 = vadd.f32 1.0, %v1094_v34  ;;  %v350_v36 = vpop.f32.mrb[8].mxu1 }
 0x1fb   :  { %v1096_v37 = vpop.eup %1095  ;;  %v351_v38 = vadd.f32 %v838_v17, %v350_v36  ;;  %v974_v39 = vpop.f32.mrb[9].mxu1 }
 0x1fc   :  { %1101 = vrcp.f32 %v375_v35  ;;  %v376_v40 = vadd.f32 1.0, %v1096_v37  ;;  %v353_v41 = vpop.f32.mrb[10].mxu1 }
 0x1fd   :  { %v851_v42 = vmul.f32 -1.442695, %v351_v38  ;;  %v354_v43 = vadd.f32 %v838_v17, %v353_v41  ;;  %v975_v44 = vpop.f32.mrb[11].mxu1 }
 0x1fe   :  { %1103 = vrcp.f32 %v376_v40 }
 0x1ff   :  { %1105 = vpow2.f32 %v851_v42  ;;  %v852_v45 = vmul.f32 -1.442695, %v354_v43 }
 0x201   :  { %v1098_v46 = vpop.eup %1097  ;;  %1107 = vpow2.f32 %v852_v45 }
 0x202   :  { %v377_v47 = vadd.f32 1.0, %v1098_v46 }
 0x203   :  { %v1100_v48 = vpop.eup %1099 }
 0x204   :  { %1109 = vrcp.f32 %v377_v47  ;;  %v378_v49 = vadd.f32 1.0, %v1100_v48 }
 0x206   :  { %v1102_v50 = vpop.eup %1101  ;;  %1111 = vrcp.f32 %v378_v49 }
 0x207   :  { %v393_v51 = vmul.f32 %v1102_v50, %v335_v19 }
 0x208   :  { %v1104_v52 = vpop.eup %1103 }
 0x209   :  { %v1106_v53 = vpop.eup %1105  ;;  %746 = vst [vmem:[%s1401_s8] sm:$0xff] %v393_v51  ;;  %v394_v54 = vmul.f32 %v1104_v52, %v338_v23 }
 0x20a   :  { %v379_v55 = vadd.f32 1.0, %v1106_v53 }
 0x20b   :  { %v1108_v56 = vpop.eup %1107  ;;  %v405_v57 = vpack.c.bf16 %v394_v54, %v393_v51  ;;  %748 = vst [vmem:[%s1401_s8 + $0x8] sm:$0xff] %v394_v54 }
 0x20c   :  { %1113 = vrcp.f32 %v379_v55  ;;  %v380_v58 = vadd.f32 1.0, %v1108_v56 }
 0x20d   :  { %993 = vmatmul.mubr.bf16.vlgmr.msra.gmra.mrb[12].mxu0 %v405_v57 }
 0x20e   :  { %v1110_v59 = vpop.eup %1109  ;;  %1115 = vrcp.f32 %v380_v58  ;;  %996 = vmatprep.mubr.msk.bf16.mxu0 %vm1142_vm0, %v1141_v1 }
 0x20f   :  { %v395_v60 = vmul.f32 %v1110_v59, %v343_v27 }
 0x210   :  { %v1112_v61 = vpop.eup %1111 }
 0x211   :  { %750 = vst [vmem:[%s1401_s8 + $0x10] sm:$0xff] %v395_v60  ;;  %v396_v62 = vmul.f32 %v1112_v61, %v346_v31 }
 0x213   :  { %752 = vst [vmem:[%s1401_s8 + $0x18] sm:$0xff] %v396_v62  ;;  %v406_v63 = vpack.c.bf16 %v396_v62, %v395_v60 }
 0x215   :  { %997 = vmatmul.mubr.bf16.gmra.mrb[16].mxu0 %v406_v63 }
 0x216   :  { %v1114_v0 = vpop.eup %1113  ;;  %1000 = vmatprep.mubr.msk.bf16.mxu0 %vm1142_vm0, %v1141_v1 }
 0x217   :  { %v397_v2 = vmul.f32 %v1114_v0, %v351_v38 }
 0x218   :  { %v1116_v3 = vpop.eup %1115 }
 0x219   :  { %754 = vst [vmem:[%s1401_s8 + $0x20] sm:$0xff] %v397_v2  ;;  %v398_v4 = vmul.f32 %v1116_v3, %v354_v43 }
 0x21b   :  { %v407_v5 = vpack.c.bf16 %v398_v4, %v397_v2 }
 0x21d   :  { %1001 = vmatmul.mubr.bf16.gmra.mrb[20].mxu0 %v407_v5 }
 0x2e0   :  { %v513_v15 = vpop.f32.mrb[12].mxu0 }
 0x2e1   :  { %v514_v16 = vadd.f32 %v853_v14, %v513_v15  ;;  %v994_v17 = vpop.f32.mrb[13].mxu0 }
 0x2e2   :  { %v516_v18 = vpop.f32.mrb[14].mxu0 }
 0x2e3   :  { %v862_v19 = vmul.f32 -1.442695, %v514_v16  ;;  %v517_v20 = vadd.f32 %v853_v14, %v516_v18  ;;  %v995_v21 = vpop.f32.mrb[15].mxu0 }
 0x2e5   :  { %1117 = vpow2.f32 %v862_v19  ;;  %v863_v22 = vmul.f32 -1.442695, %v517_v20 }
 0x2e7   :  { %1119 = vpow2.f32 %v863_v22 }
 0x2e8   :  { %v521_v23 = vpop.f32.mrb[16].mxu0 }
 0x2e9   :  { %v522_v24 = vadd.f32 %v853_v14, %v521_v23  ;;  %v998_v25 = vpop.f32.mrb[17].mxu0 }
 0x2ea   :  { %v524_v26 = vpop.f32.mrb[18].mxu0 }
 0x2eb   :  { %v864_v27 = vmul.f32 -1.442695, %v522_v24  ;;  %v525_v28 = vadd.f32 %v853_v14, %v524_v26  ;;  %v999_v29 = vpop.f32.mrb[19].mxu0 }
 0x2ed   :  { %1121 = vpow2.f32 %v864_v27  ;;  %v865_v30 = vmul.f32 -1.442695, %v525_v28 }
 0x2ef   :  { %v1118_v31 = vpop.eup %1117  ;;  %1123 = vpow2.f32 %v865_v30 }
 0x2f0   :  { %v554_v32 = vadd.f32 1.0, %v1118_v31  ;;  %v529_v33 = vpop.f32.mrb[20].mxu0 }
 0x2f1   :  { %v1120_v34 = vpop.eup %1119  ;;  %v530_v35 = vadd.f32 %v853_v14, %v529_v33  ;;  %v1002_v36 = vpop.f32.mrb[21].mxu0 }
 0x2f2   :  { %1125 = vrcp.f32 %v554_v32  ;;  %v555_v37 = vadd.f32 1.0, %v1120_v34  ;;  %v532_v38 = vpop.f32.mrb[22].mxu0 }
 0x2f3   :  { %v866_v39 = vmul.f32 -1.442695, %v530_v35  ;;  %v533_v40 = vadd.f32 %v853_v14, %v532_v38  ;;  %v1003_v41 = vpop.f32.mrb[23].mxu0 }
 0x2f4   :  { %1127 = vrcp.f32 %v555_v37 }
 0x2f5   :  { %1129 = vpow2.f32 %v866_v39  ;;  %v867_v42 = vmul.f32 -1.442695, %v533_v40 }
 0x2f7   :  { %v1122_v43 = vpop.eup %1121  ;;  %1131 = vpow2.f32 %v867_v42 }
 0x2f8   :  { %v556_v44 = vadd.f32 1.0, %v1122_v43 }
 0x2f9   :  { %v1124_v45 = vpop.eup %1123 }
 0x2fa   :  { %1133 = vrcp.f32 %v556_v44  ;;  %v557_v46 = vadd.f32 1.0, %v1124_v45 }
 0x2fc   :  { %v1126_v47 = vpop.eup %1125  ;;  %1135 = vrcp.f32 %v557_v46 }
 0x2fd   :  { %v572_v50 = vmul.f32 %v1126_v47, %v514_v16 }
 0x2fe   :  { %v1128_v48 = vpop.eup %1127 }
 0x2ff   :  { %v1130_v49 = vpop.eup %1129  ;;  %v573_v51 = vmul.f32 %v1128_v48, %v517_v20 }
 0x300   :  { %v558_v52 = vadd.f32 1.0, %v1130_v49 }
 0x301   :  { %v1132_v53 = vpop.eup %1131  ;;  %v578_v54 = vpack.c.bf16 %v573_v51, %v572_v50 }
 0x302   :  { %1137 = vrcp.f32 %v558_v52  ;;  %v559_v55 = vadd.f32 1.0, %v1132_v53 }
 0x303   :  { %1021 = vmatmul.mubr.bf16.vlgmr.msra.gmra.mrb[12].mxu1 %v578_v54 }
 0x304   :  { %v1134_v56 = vpop.eup %1133  ;;  %1139 = vrcp.f32 %v559_v55  ;;  %1024 = vmatprep.mubr.msk.bf16.mxu1 %vm1142_vm0, %v1141_v1 }
 0x305   :  { %v574_v58 = vmul.f32 %v1134_v56, %v522_v24 }
 0x306   :  { %v1136_v57 = vpop.eup %1135 }
 0x307   :  { %v575_v59 = vmul.f32 %v1136_v57, %v525_v28 }
 0x309   :  { %v579_v60 = vpack.c.bf16 %v575_v59, %v574_v58 }
 0x30b   :  { %1025 = vmatmul.mubr.bf16.gmra.mrb[16].mxu1 %v579_v60 }
 0x30c   :  { %v1138_v61 = vpop.eup %1137  ;;  %1028 = vmatprep.mubr.msk.bf16.mxu1 %vm1142_vm0, %v1141_v1 }
 0x30d   :  { %v576_v63 = vmul.f32 %v1138_v61, %v530_v35 }
 0x30e   :  { %v1140_v62 = vpop.eup %1139 }
 0x30f   :  { %v577_v0 = vmul.f32 %v1140_v62, %v533_v40 }
 0x311   :  { %v580_v2 = vpack.c.bf16 %v577_v0, %v576_v63 }
 0x313   :  { %1029 = vmatmul.mubr.bf16.gmra.mrb[20].mxu1 %v580_v2 }
 0x3d6   :  { %v679_v3 = vpop.f32.mrb[12].mxu1 }
 0x3d7   :  { %796 = vst [vmem:[%s1402_s9] sm:$0xff] %v679_v3  ;;  %v1022_v4 = vpop.f32.mrb[13].mxu1 }
 0x3d8   :  { %v682_v5 = vpop.f32.mrb[14].mxu1 }
 0x3d9   :  { %798 = vst [vmem:[%s1402_s9 + $0x8] sm:$0xff] %v682_v5  ;;  %v1023_v6 = vpop.f32.mrb[15].mxu1 }
 0x3de   :  { %v687_v7 = vpop.f32.mrb[16].mxu1 }
 0x3df   :  { %800 = vst [vmem:[%s1402_s9 + $0x10] sm:$0xff] %v687_v7  ;;  %v1026_v1 = vpop.f32.mrb[17].mxu1 }
 0x3e0   :  { %v690_v8 = vpop.f32.mrb[18].mxu1 }
 0x3e1   :  { %802 = vst [vmem:[%s1402_s9 + $0x18] sm:$0xff] %v690_v8  ;;  %v1027_v9 = vpop.f32.mrb[19].mxu1 }
 0x3e6   :  { %v695_v10 = vpop.f32.mrb[20].mxu1 }
 0x3e7   :  { %804 = vst [vmem:[%s1402_s9 + $0x20] sm:$0xff] %v695_v10  ;;  %v1030_v11 = vpop.f32.mrb[21].mxu1 }
 0x3e8   :  { %v698_v12 = vpop.f32.mrb[22].mxu1 }
 0x3e9   :  { %v1031_v13 = vpop.f32.mrb[23].mxu1 }

// kernel: e_gcl_vel_forward.6
= control target key start
LH: loop header
LB: loop body
LE: loop exit
PB: predicated region body
PF: predicated region fallthrough
CT: control target
= control target key end

     0   :  { %s1342_s0 = inlined_call_operand.vmem [shape: bf16[20,256], index: 0, kind: input, shape index: {}]   ;;  %s1343_s1 = inlined_call_operand.vmem [shape: bf16[256,128], index: 1, kind: input, shape index: {}]   ;;  %s1344_s2 = inlined_call_operand.vmem [shape: f32[1,128], index: 2, kind: input, shape index: {}]   ;;  %s1345_s3 = inlined_call_operand.vmem [shape: bf16[128,128], index: 3, kind: input, shape index: {}]   ;;  %s1346_s4 = inlined_call_operand.vmem [shape: f32[1,128], index: 4, kind: input, shape index: {}]   ;;  %s1347_s5 = inlined_call_operand.vmem [shape: bf16[256,128], index: 5, kind: input, shape index: {}]   ;;  %s1348_s6 = inlined_call_operand.vmem [shape: f32[1,128], index: 6, kind: input, shape index: {}]   ;;  %s1349_s7 = inlined_call_operand.vmem [shape: bf16[128,128], index: 7, kind: input, shape index: {}]   ;;  %s1350_s8 = inlined_call_operand.vmem [shape: f32[1,128], index: 8, kind: input, shape index: {}]   ;;  %s1351_s9 = inlined_call_operand.vmem [shape: f32[20,128], index: 9, kind: output, shape index: {0}]   ;;  %s1352_s10 = inlined_call_operand.vmem [shape: f32[20,128], index: 10, kind: output, shape index: {1}]  }
   0x1   :  { %v1011_v0 = vld [vmem:[%s1343_s1 + $0x40] sm:$0xff]   ;;  %v1013_v2 = vld [vmem:[%s1343_s1 + $0x48] sm:$0xff]   ;;  %v1015_v4 = vld [vmem:[%s1343_s1 + $0x50] sm:$0xff]  }
   0x2   :  { %v1012_v1 = vld [vmem:[%s1343_s1] sm:$0xff]   ;;  %895 = vmatprep.subr.bf16.mxu0 %v1011_v0  ;;  %v1014_v3 = vld [vmem:[%s1343_s1 + $0x8] sm:$0xff]   ;;  %v1016_v5 = vld [vmem:[%s1343_s1 + $0x10] sm:$0xff]  }
   0x3   :  { %896 = vmatpush3.bf16.msra.mxu0 %v1012_v1  ;;  %v1017_v6 = vld [vmem:[%s1343_s1 + $0x58] sm:$0xff]   ;;  %v1019_v8 = vld [vmem:[%s1343_s1 + $0x60] sm:$0xff]   ;;  %v1021_v10 = vld [vmem:[%s1343_s1 + $0x68] sm:$0xff]  }
   0x4   :  { %897 = vmatprep.subr.bf16.mxu0 %v1013_v2  ;;  %v1018_v7 = vld [vmem:[%s1343_s1 + $0x18] sm:$0xff]   ;;  %v1020_v9 = vld [vmem:[%s1343_s1 + $0x20] sm:$0xff]   ;;  %v1022_v12 = vld [vmem:[%s1343_s1 + $0x28] sm:$0xff]  }
   0x5   :  { %v1029_v11 = vld [vmem:[%s1342_s0 + $0x4] ss:$8 sps:$4 sm:$0xff]   ;;  %v1023_v13 = vld [vmem:[%s1343_s1 + $0x70] sm:$0xff]   ;;  %v1025_v15 = vld [vmem:[%s1343_s1 + $0x78] sm:$0xff]  }
   0x6   :  { %226 = vmatprep.mubr.bf16.mxu0 %v1029_v11  ;;  %v1024_v14 = vld [vmem:[%s1343_s1 + $0x30] sm:$0xff]   ;;  %v1026_v16 = vld [vmem:[%s1343_s1 + $0x38] sm:$0xff]   ;;  %v1030_v17 = vld [vmem:[%s1347_s5 + $0x40] sm:$0xff]  }
   0x7   :  { %898 = vmatpush3.bf16.msra.mxu0 %v1014_v3  ;;  %v1027_v18 = vld [vmem:[%s1342_s0] ss:$8 sps:$4 sm:$0xff]   ;;  %v1034_v20 = vld [vmem:[%s1342_s0 + $0x14] ss:$8 sps:$4 sm:$0xff]   ;;  %v1036_v24 = vld [vmem:[%s1342_s0 + $0x10] ss:$8 sps:$4 sm:$0xff]  }
   0x8   :  { %899 = vmatprep.subr.bf16.mxu0 %v1015_v4  ;;  %v1031_v19 = vld [vmem:[%s1347_s5] sm:$0xff]   ;;  %v1032_v21 = vld [vmem:[%s1347_s5 + $0x48] sm:$0xff]   ;;  %v1037_v23 = vld [vmem:[%s1347_s5 + $0x50] sm:$0xff]  }
   0x9   :  { %v1033_v22 = vld [vmem:[%s1347_s5 + $0x8] sm:$0xff]   ;;  %v1038_v25 = vld [vmem:[%s1347_s5 + $0x10] sm:$0xff]   ;;  %v1039_v26 = vld [vmem:[%s1347_s5 + $0x58] sm:$0xff]  }
   0xa   :  { %v1040_v27 = vld [vmem:[%s1347_s5 + $0x18] sm:$0xff]   ;;  %v1041_v28 = vld [vmem:[%s1347_s5 + $0x60] sm:$0xff]   ;;  %v1043_v30 = vld [vmem:[%s1347_s5 + $0x68] sm:$0xff]  }
   0xb   :  { %900 = vmatpush3.bf16.msra.mxu0 %v1016_v5  ;;  %v1042_v29 = vld [vmem:[%s1347_s5 + $0x20] sm:$0xff]   ;;  %v1044_v31 = vld [vmem:[%s1347_s5 + $0x28] sm:$0xff]   ;;  %v1045_v32 = vld [vmem:[%s1347_s5 + $0x70] sm:$0xff]  }
   0xc   :  { %901 = vmatprep.subr.bf16.mxu0 %v1017_v6  ;;  %v1046_v33 = vld [vmem:[%s1347_s5 + $0x30] sm:$0xff]   ;;  %v1047_v34 = vld [vmem:[%s1347_s5 + $0x78] sm:$0xff]   ;;  %v1049_v36 = vld [vmem:[%s1345_s3] sm:$0xff]  }
   0xd   :  { %v1048_v35 = vld [vmem:[%s1347_s5 + $0x38] sm:$0xff]   ;;  %971 = vmatprep.subr.bf16.mxu1 %v1049_v36  ;;  %v1050_v37 = vld [vmem:[%s1345_s3 + $0x8] sm:$0xff]   ;;  %v1051_v38 = vld [vmem:[%s1345_s3 + $0x10] sm:$0xff]  }
   0xe   :  { %972 = vmatpush3.bf16.msra.mxu1 %v1049_v36  ;;  %v1052_v39 = vld [vmem:[%s1345_s3 + $0x18] sm:$0xff]   ;;  %v1053_v40 = vld [vmem:[%s1345_s3 + $0x20] sm:$0xff]   ;;  %v1054_v41 = vld [vmem:[%s1345_s3 + $0x28] sm:$0xff]  }
   0xf   :  { %902 = vmatpush3.bf16.msra.mxu0 %v1018_v7  ;;  %973 = vmatprep.subr.bf16.mxu1 %v1050_v37  ;;  %v1055_v42 = vld [vmem:[%s1345_s3 + $0x30] sm:$0xff]   ;;  %v1056_v43 = vld [vmem:[%s1345_s3 + $0x38] sm:$0xff]   ;;  %v1287_v44 = vld [vmem:[%s1349_s7] sm:$0xff]  }
  0x10   :  { %903 = vmatprep.subr.bf16.mxu0 %v1019_v8  ;;  %v831_v46 = vld [vmem:[%s1344_s2] ss:$0 sm:$0xff] }
  0x12   :  { %974 = vmatpush3.bf16.msra.mxu1 %v1050_v37 }
  0x13   :  { %904 = vmatpush3.bf16.msra.mxu0 %v1020_v9  ;;  %975 = vmatprep.subr.bf16.mxu1 %v1051_v38 }
  0x14   :  { %905 = vmatprep.subr.bf16.mxu0 %v1021_v10 }
  0x16   :  { %976 = vmatpush3.bf16.msra.mxu1 %v1051_v38  ;;  %v1058_v38 = vld [vmem:[%s1349_s7 + $0x8] sm:$0xff]  }
  0x17   :  { %906 = vmatpush3.bf16.msra.mxu0 %v1022_v12  ;;  %977 = vmatprep.subr.bf16.mxu1 %v1052_v39 }
  0x18   :  { %907 = vmatprep.subr.bf16.mxu0 %v1023_v13  ;;  %v865_v13 = vld [vmem:[%s1348_s6] ss:$0 sm:$0xff] }
  0x1a   :  { %978 = vmatpush3.bf16.msra.mxu1 %v1052_v39 }
  0x1b   :  { %908 = vmatpush3.bf16.msra.mxu0 %v1024_v14  ;;  %979 = vmatprep.subr.bf16.mxu1 %v1053_v40 }
  0x1c   :  { %909 = vmatprep.subr.bf16.mxu0 %v1025_v15 }
  0x1e   :  { %980 = vmatpush3.bf16.msra.mxu1 %v1053_v40 }
  0x1f   :  { %910 = vmatpush3.bf16.msra.mxu0 %v1026_v16  ;;  %981 = vmatprep.subr.bf16.mxu1 %v1054_v41 }
  0x20   :  { %933 = vmatprep.subr.bf16.mxu0 %v1030_v17 }
  0x22   :  { %227 = vmatmul.mubr.bf16.vlgmr.msra.gmra.mrb[0].mxu0 %v1027_v18  ;;  %982 = vmatpush3.bf16.msra.mxu1 %v1054_v41 }
  0x23   :  { %934 = vmatpush3.bf16.msra.mxu0 %v1031_v19  ;;  %234 = vmatprep.mubr.bf16.mxu0 %v1034_v20 }
  0x24   :  { %935 = vmatprep.subr.bf16.mxu0 %v1032_v21  ;;  %983 = vmatprep.subr.bf16.mxu1 %v1055_v42 }
  0x26   :  { %984 = vmatpush3.bf16.msra.mxu1 %v1055_v42  ;;  %v1059_v42 = vld [vmem:[%s1349_s7 + $0x10] sm:$0xff]  }
  0x27   :  { %936 = vmatpush3.bf16.msra.mxu0 %v1033_v22  ;;  %985 = vmatprep.subr.bf16.mxu1 %v1056_v43 }
  0x28   :  { %937 = vmatprep.subr.bf16.mxu0 %v1037_v23 }
  0x2a   :  { %235 = vmatmul.mubr.bf16.gmra.mrb[4].mxu0 %v1036_v24  ;;  %986 = vmatpush3.bf16.msra.mxu1 %v1056_v43 }
  0x2b   :  { %938 = vmatpush3.bf16.msra.mxu0 %v1038_v25  ;;  %564 = vmatprep.mubr.bf16.mxu0 %v1029_v11 }
  0x2c   :  { %939 = vmatprep.subr.bf16.mxu0 %v1039_v26  ;;  %991 = vmatprep.subr.bf16.mxu1 %v1287_v44 }
  0x2f   :  { %940 = vmatpush3.bf16.msra.mxu0 %v1040_v27 }
  0x30   :  { %941 = vmatprep.subr.bf16.mxu0 %v1041_v28 }
  0x33   :  { %942 = vmatpush3.bf16.msra.mxu0 %v1042_v29 }
  0x34   :  { %943 = vmatprep.subr.bf16.mxu0 %v1043_v30 }
  0x37   :  { %944 = vmatpush3.bf16.msra.mxu0 %v1044_v31 }
  0x38   :  { %945 = vmatprep.subr.bf16.mxu0 %v1045_v32 }
  0x3b   :  { %946 = vmatpush3.bf16.msra.mxu0 %v1046_v33 }
  0x3c   :  { %947 = vmatprep.subr.bf16.mxu0 %v1047_v34 }
  0x3f   :  { %948 = vmatpush3.bf16.msra.mxu0 %v1048_v35 }
  0x42   :  { %565 = vmatmul.mubr.bf16.vlgmr.msra.gmra.mrb[8].mxu0 %v1027_v18 }
  0x43   :  { %572 = vmatprep.mubr.bf16.mxu0 %v1034_v20 }
  0x4a   :  { %573 = vmatmul.mubr.bf16.gmra.mrb[12].mxu0 %v1036_v24 }
  0xf5   :  { %v911_v45 = vpop.f32.mrb[0].mxu0 }
  0xf6   :  { %v912_v47 = vpop.f32.mrb[1].mxu0 }
  0xf7   :  { %v913_v48 = vadd.f32 %v912_v47, %v911_v45  ;;  %v914_v49 = vpop.f32.mrb[2].mxu0  ;;  %v1060_v47 = vld [vmem:[%s1349_s7 + $0x18] sm:$0xff]  }
  0xf8   :  { %v915_v50 = vpop.f32.mrb[3].mxu0 }
  0xf9   :  { %v229_v51 = vadd.f32 %v913_v48, %v831_v46  ;;  %v916_v52 = vadd.f32 %v915_v50, %v914_v49 }
  0xfb   :  { %v852_v53 = vmul.f32 -1.442695, %v229_v51  ;;  %v232_v54 = vadd.f32 %v916_v52, %v831_v46  ;;  %v1062_v52 = vld [vmem:[%s1349_s7 + $0x28] sm:$0xff]  }
  0xfd   :  { %1065 = vpow2.f32 %v852_v53  ;;  %v853_v55 = vmul.f32 -1.442695, %v232_v54  ;;  %v917_v56 = vpop.f32.mrb[4].mxu0 }
  0xfe   :  { %v918_v57 = vpop.f32.mrb[5].mxu0 }
  0xff   :  { %1067 = vpow2.f32 %v853_v55  ;;  %v919_v58 = vadd.f32 %v918_v57, %v917_v56  ;;  %v920_v59 = vpop.f32.mrb[6].mxu0  ;;  %v1063_v55 = vld [vmem:[%s1349_s7 + $0x30] sm:$0xff]  }
 0x100   :  { %v921_v60 = vpop.f32.mrb[7].mxu0 }
 0x101   :  { %v237_v61 = vadd.f32 %v919_v58, %v831_v46  ;;  %v922_v62 = vadd.f32 %v921_v60, %v920_v59  ;;  %v1064_v60 = vld [vmem:[%s1349_s7 + $0x38] sm:$0xff]  }
 0x103   :  { %v854_v63 = vmul.f32 -1.442695, %v237_v61  ;;  %v240_v0 = vadd.f32 %v922_v62, %v831_v46 }
 0x105   :  { %1069 = vpow2.f32 %v854_v63  ;;  %v855_v1 = vmul.f32 -1.442695, %v240_v0 }
 0x107   :  { %v1066_v2 = vpop.eup %1065  ;;  %1071 = vpow2.f32 %v855_v1 }
 0x108   :  { %v255_v3 = vadd.f32 1.0, %v1066_v2  ;;  %v856_v2 = vld [vmem:[%s1346_s4] ss:$0 sm:$0xff] }
 0x109   :  { %v1068_v4 = vpop.eup %1067 }
 0x10a   :  { %1073 = vrcp.f32 %v255_v3  ;;  %v256_v5 = vadd.f32 1.0, %v1068_v4 }
 0x10c   :  { %1075 = vrcp.f32 %v256_v5 }
 0x10f   :  { %v1070_v6 = vpop.eup %1069 }
 0x110   :  { %v257_v7 = vadd.f32 1.0, %v1070_v6 }
 0x111   :  { %v1072_v8 = vpop.eup %1071 }
 0x112   :  { %1077 = vrcp.f32 %v257_v7  ;;  %v258_v9 = vadd.f32 1.0, %v1072_v8 }
 0x114   :  { %v1074_v10 = vpop.eup %1073  ;;  %1079 = vrcp.f32 %v258_v9 }
 0x115   :  { %v949_v11 = vpop.f32.mrb[8].mxu0  ;;  %v267_v17 = vmul.f32 %v1074_v10, %v229_v51  ;;  %v886_v10 = vld [vmem:[%s1350_s8] ss:$0 sm:$0xff] }
 0x116   :  { %v1076_v12 = vpop.eup %1075  ;;  %v950_v14 = vpop.f32.mrb[9].mxu0 }
 0x117   :  { %v951_v15 = vadd.f32 %v950_v14, %v949_v11  ;;  %v952_v16 = vpop.f32.mrb[10].mxu0  ;;  %v268_v18 = vmul.f32 %v1076_v12, %v232_v54 }
 0x118   :  { %v953_v19 = vpop.f32.mrb[11].mxu0 }
 0x119   :  { %v567_v20 = vadd.f32 %v951_v15, %v865_v13  ;;  %v954_v21 = vadd.f32 %v953_v19, %v952_v16  ;;  %v271_v22 = vpack.c.bf16 %v268_v18, %v267_v17 }
 0x11b   :  { %v882_v23 = vmul.f32 -1.442695, %v567_v20  ;;  %v570_v24 = vadd.f32 %v954_v21, %v865_v13  ;;  %987 = vmatprep.mubr.bf16.mxu1 %v271_v22 }
 0x11c   :  { %v1078_v25 = vpop.eup %1077 }
 0x11d   :  { %1081 = vpow2.f32 %v882_v23  ;;  %v883_v26 = vmul.f32 -1.442695, %v570_v24  ;;  %v955_v27 = vpop.f32.mrb[12].mxu0  ;;  %v269_v30 = vmul.f32 %v1078_v25, %v237_v61 }
 0x11e   :  { %v1080_v28 = vpop.eup %1079  ;;  %v956_v29 = vpop.f32.mrb[13].mxu0 }
 0x11f   :  { %v270_v31 = vmul.f32 %v1080_v28, %v240_v0  ;;  %1083 = vpow2.f32 %v883_v26  ;;  %v957_v32 = vadd.f32 %v956_v29, %v955_v27  ;;  %v958_v33 = vpop.f32.mrb[14].mxu0 }
 0x120   :  { %v959_v34 = vpop.f32.mrb[15].mxu0 }
 0x121   :  { %v575_v35 = vadd.f32 %v957_v32, %v865_v13  ;;  %v960_v36 = vadd.f32 %v959_v34, %v958_v33  ;;  %v272_v37 = vpack.c.bf16 %v270_v31, %v269_v30 }
 0x123   :  { %v884_v39 = vmul.f32 -1.442695, %v575_v35  ;;  %v578_v40 = vadd.f32 %v960_v36, %v865_v13  ;;  %988 = vmatmul.mubr.bf16.vlgmr.msra.gmra.mrb[0].mxu1 %v272_v37 }
 0x124   :  { %992 = vmatpush3.bf16.msra.mxu1 %v1287_v44  ;;  %v1061_v44 = vld [vmem:[%s1349_s7 + $0x20] sm:$0xff]  }
 0x125   :  { %1085 = vpow2.f32 %v884_v39  ;;  %v885_v41 = vmul.f32 -1.442695, %v578_v40  ;;  %993 = vmatprep.subr.bf16.mxu1 %v1058_v38 }
 0x127   :  { %v1082_v43 = vpop.eup %1081  ;;  %1087 = vpow2.f32 %v885_v41 }
 0x128   :  { %v593_v45 = vadd.f32 1.0, %v1082_v43  ;;  %994 = vmatpush3.bf16.msra.mxu1 %v1058_v38 }
 0x129   :  { %v1084_v46 = vpop.eup %1083  ;;  %995 = vmatprep.subr.bf16.mxu1 %v1059_v42 }
 0x12a   :  { %1089 = vrcp.f32 %v593_v45  ;;  %v594_v48 = vadd.f32 1.0, %v1084_v46 }
 0x12c   :  { %1091 = vrcp.f32 %v594_v48  ;;  %996 = vmatpush3.bf16.msra.mxu1 %v1059_v42 }
 0x12d   :  { %997 = vmatprep.subr.bf16.mxu1 %v1060_v47 }
 0x12f   :  { %v1086_v49 = vpop.eup %1085 }
 0x130   :  { %v595_v50 = vadd.f32 1.0, %v1086_v49  ;;  %998 = vmatpush3.bf16.msra.mxu1 %v1060_v47 }
 0x131   :  { %v1088_v51 = vpop.eup %1087  ;;  %999 = vmatprep.subr.bf16.mxu1 %v1061_v44 }
 0x132   :  { %1093 = vrcp.f32 %v595_v50  ;;  %v596_v53 = vadd.f32 1.0, %v1088_v51 }
 0x134   :  { %v1090_v54 = vpop.eup %1089  ;;  %1095 = vrcp.f32 %v596_v53  ;;  %1000 = vmatpush3.bf16.msra.mxu1 %v1061_v44 }
 0x135   :  { %1001 = vmatprep.subr.bf16.mxu1 %v1062_v52  ;;  %v605_v57 = vmul.f32 %v1090_v54, %v567_v20 }
 0x136   :  { %v1092_v56 = vpop.eup %1091 }
 0x137   :  { %v606_v58 = vmul.f32 %v1092_v56, %v570_v24 }
 0x138   :  { %1002 = vmatpush3.bf16.msra.mxu1 %v1062_v52 }
 0x139   :  { %1003 = vmatprep.subr.bf16.mxu1 %v1063_v55  ;;  %v609_v59 = vpack.c.bf16 %v606_v58, %v605_v57 }
 0x13b   :  { %1007 = vmatprep.mubr.bf16.mxu1 %v609_v59 }
 0x13c   :  { %v1094_v61 = vpop.eup %1093  ;;  %1004 = vmatpush3.bf16.msra.mxu1 %v1063_v55 }
 0x13d   :  { %1005 = vmatprep.subr.bf16.mxu1 %v1064_v60  ;;  %v607_v63 = vmul.f32 %v1094_v61, %v575_v35 }
 0x13e   :  { %v1096_v62 = vpop.eup %1095 }
 0x13f   :  { %v608_v0 = vmul.f32 %v1096_v62, %v578_v40 }
 0x140   :  { %1006 = vmatpush3.bf16.msra.mxu1 %v1064_v60 }
 0x141   :  { %v610_v1 = vpack.c.bf16 %v608_v0, %v607_v63 }
 0x143   :  { %1008 = vmatmul.mubr.bf16.vlgmr.msra.gmra.mrb[4].mxu1 %v610_v1 }
 0x1f6   :  { %v989_v3 = vpop.f32.mrb[0].mxu1 }
 0x1f7   :  { %v387_v4 = vadd.f32 %v989_v3, %v856_v2  ;;  %v378_v5 = vpop.f32.mrb[1].mxu1 }
 0x1f8   :  { %v379_v6 = vadd.f32 %v856_v2, %v378_v5  ;;  %v990_v7 = vpop.f32.mrb[2].mxu1 }
 0x1f9   :  { %773 = vst [vmem:[%s1351_s9 + $0x10] sm:$0xff] %v387_v4  ;;  %v381_v8 = vpop.f32.mrb[3].mxu1 }
 0x1fa   :  { %769 = vst [vmem:[%s1351_s9] sm:$0xff] %v379_v6  ;;  %v382_v9 = vadd.f32 %v856_v2, %v381_v8 }
 0x1fc   :  { %771 = vst [vmem:[%s1351_s9 + $0x8] sm:$0xff] %v382_v9 }
 0x216   :  { %v1009_v11 = vpop.f32.mrb[4].mxu1 }
 0x217   :  { %v725_v12 = vadd.f32 %v1009_v11, %v886_v10  ;;  %v716_v13 = vpop.f32.mrb[5].mxu1 }
 0x218   :  { %v717_v14 = vadd.f32 %v886_v10, %v716_v13  ;;  %v1010_v15 = vpop.f32.mrb[6].mxu1 }
 0x219   :  { %815 = vst [vmem:[%s1352_s10 + $0x10] sm:$0xff] %v725_v12  ;;  %v719_v16 = vpop.f32.mrb[7].mxu1 }
 0x21a   :  { %811 = vst [vmem:[%s1352_s10] sm:$0xff] %v717_v14  ;;  %v720_v17 = vadd.f32 %v886_v10, %v719_v16 }
 0x21c   :  { %813 = vst [vmem:[%s1352_s10 + $0x8] sm:$0xff] %v720_v17 }

// kernel: e_gcl_vel_forward.7
= control target key start
LH: loop header
LB: loop body
LE: loop exit
PB: predicated region body
PF: predicated region fallthrough
CT: control target
= control target key end

     0   :  { %v416_v1 = vmov 0.0   ;;  %vm417_vm0 = vmmov 0   ;;  %s508_s0 = inlined_call_operand.vmem [shape: bf16[8,128], index: 0, kind: input, shape index: {}]   ;;  %s509_s1 = inlined_call_operand.vmem [shape: bf16[128,128], index: 1, kind: input, shape index: {}]   ;;  %s510_s2 = inlined_call_operand.vmem [shape: f32[1,128], index: 2, kind: input, shape index: {}]   ;;  %s511_s3 = inlined_call_operand.vmem [shape: bf16[128,128], index: 3, kind: input, shape index: {}]   ;;  %s512_s4 = inlined_call_operand.vmem [shape: f32[1,128], index: 4, kind: input, shape index: {}]   ;;  %s513_s5 = inlined_call_operand.vmem [shape: f32[8,128], index: 5, kind: output, shape index: {}]  }
   0x1   :  { %v391_v0 = vld [vmem:[%s509_s1] sm:$0xff]   ;;  %349 = vmatprep.subr.bf16.mxu0 %v416_v1  ;;  %369 = vmatprep.subr.bf16.mxu1 %v416_v1  ;;  %v392_v2 = vld [vmem:[%s509_s1 + $0x8] sm:$0xff]   ;;  %v393_v3 = vld [vmem:[%s509_s1 + $0x10] sm:$0xff]  }
   0x2   :  { %350 = vmatpush3.bf16.msra.mxu0 %v391_v0  ;;  %365 = vmatprep.mubr.msk.bf16.mxu0 %vm417_vm0, %v416_v1  ;;  %v394_v4 = vld [vmem:[%s509_s1 + $0x18] sm:$0xff]   ;;  %v395_v5 = vld [vmem:[%s509_s1 + $0x20] sm:$0xff]   ;;  %v396_v6 = vld [vmem:[%s509_s1 + $0x28] sm:$0xff]  }
   0x3   :  { %351 = vmatprep.subr.bf16.mxu0 %v416_v1  ;;  %385 = vmatprep.mubr.msk.bf16.mxu1 %vm417_vm0, %v416_v1  ;;  %v397_v7 = vld [vmem:[%s509_s1 + $0x30] sm:$0xff]   ;;  %v398_v8 = vld [vmem:[%s509_s1 + $0x38] sm:$0xff]   ;;  %v399_v9 = vld [vmem:[%s508_s0] sm:$0xff]  }
   0x4   :  { %v400_v10 = vld [vmem:[%s511_s3] sm:$0xff]   ;;  %v401_v11 = vld [vmem:[%s511_s3 + $0x8] sm:$0xff]   ;;  %v402_v12 = vld [vmem:[%s511_s3 + $0x10] sm:$0xff]  }
   0x5   :  { %370 = vmatpush3.bf16.msra.mxu1 %v400_v10  ;;  %v403_v13 = vld [vmem:[%s511_s3 + $0x18] sm:$0xff]   ;;  %v404_v14 = vld [vmem:[%s511_s3 + $0x20] sm:$0xff]   ;;  %v405_v15 = vld [vmem:[%s511_s3 + $0x28] sm:$0xff]  }
   0x6   :  { %352 = vmatpush3.bf16.msra.mxu0 %v392_v2  ;;  %371 = vmatprep.subr.bf16.mxu1 %v416_v1  ;;  %v406_v16 = vld [vmem:[%s511_s3 + $0x30] sm:$0xff]   ;;  %v407_v17 = vld [vmem:[%s511_s3 + $0x38] sm:$0xff]   ;;  %v310_v18 = vld [vmem:[%s510_s2] ss:$0 sm:$0xff] }
   0x7   :  { %353 = vmatprep.subr.bf16.mxu0 %v416_v1  ;;  %v322_v36 = vld [vmem:[%s512_s4] ss:$0 sm:$0xff] }
   0x9   :  { %372 = vmatpush3.bf16.msra.mxu1 %v401_v11 }
   0xa   :  { %354 = vmatpush3.bf16.msra.mxu0 %v393_v3  ;;  %373 = vmatprep.subr.bf16.mxu1 %v416_v1 }
   0xb   :  { %355 = vmatprep.subr.bf16.mxu0 %v416_v1 }
   0xd   :  { %374 = vmatpush3.bf16.msra.mxu1 %v402_v12 }
   0xe   :  { %356 = vmatpush3.bf16.msra.mxu0 %v394_v4  ;;  %375 = vmatprep.subr.bf16.mxu1 %v416_v1 }
   0xf   :  { %357 = vmatprep.subr.bf16.mxu0 %v416_v1 }
  0x11   :  { %376 = vmatpush3.bf16.msra.mxu1 %v403_v13 }
  0x12   :  { %358 = vmatpush3.bf16.msra.mxu0 %v395_v5  ;;  %377 = vmatprep.subr.bf16.mxu1 %v416_v1 }
  0x13   :  { %359 = vmatprep.subr.bf16.mxu0 %v416_v1 }
  0x15   :  { %378 = vmatpush3.bf16.msra.mxu1 %v404_v14 }
  0x16   :  { %360 = vmatpush3.bf16.msra.mxu0 %v396_v6  ;;  %379 = vmatprep.subr.bf16.mxu1 %v416_v1 }
  0x17   :  { %361 = vmatprep.subr.bf16.mxu0 %v416_v1 }
  0x19   :  { %380 = vmatpush3.bf16.msra.mxu1 %v405_v15 }
  0x1a   :  { %362 = vmatpush3.bf16.msra.mxu0 %v397_v7  ;;  %381 = vmatprep.subr.bf16.mxu1 %v416_v1 }
  0x1b   :  { %363 = vmatprep.subr.bf16.mxu0 %v416_v1 }
  0x1d   :  { %382 = vmatpush3.bf16.msra.mxu1 %v406_v16 }
  0x1e   :  { %364 = vmatpush3.bf16.msra.mxu0 %v398_v8  ;;  %383 = vmatprep.subr.bf16.mxu1 %v416_v1 }
  0x21   :  { %366 = vmatmul.mubr.bf16.vlgmr.msra.gmra.mrb[0].mxu0 %v399_v9  ;;  %384 = vmatpush3.bf16.msra.mxu1 %v407_v17 }
  0xf4   :  { %v134_v19 = vpop.f32.mrb[0].mxu0 }
  0xf5   :  { %v135_v20 = vadd.f32 %v310_v18, %v134_v19  ;;  %v367_v21 = vpop.f32.mrb[1].mxu0 }
  0xf6   :  { %v137_v22 = vpop.f32.mrb[2].mxu0 }
  0xf7   :  { %v320_v23 = vmul.f32 -1.442695, %v135_v20  ;;  %v138_v24 = vadd.f32 %v310_v18, %v137_v22  ;;  %v368_v25 = vpop.f32.mrb[3].mxu0 }
  0xf9   :  { %408 = vpow2.f32 %v320_v23  ;;  %v321_v26 = vmul.f32 -1.442695, %v138_v24 }
  0xfb   :  { %410 = vpow2.f32 %v321_v26 }
 0x103   :  { %v409_v27 = vpop.eup %408 }
 0x104   :  { %v147_v28 = vadd.f32 1.0, %v409_v27 }
 0x105   :  { %v411_v29 = vpop.eup %410 }
 0x106   :  { %412 = vrcp.f32 %v147_v28  ;;  %v148_v30 = vadd.f32 1.0, %v411_v29 }
 0x108   :  { %414 = vrcp.f32 %v148_v30 }
 0x110   :  { %v413_v31 = vpop.eup %412 }
 0x111   :  { %v153_v33 = vmul.f32 %v413_v31, %v135_v20 }
 0x112   :  { %v415_v32 = vpop.eup %414 }
 0x113   :  { %v154_v34 = vmul.f32 %v415_v32, %v138_v24 }
 0x115   :  { %v155_v35 = vpack.c.bf16 %v154_v34, %v153_v33 }
 0x117   :  { %386 = vmatmul.mubr.bf16.vlgmr.msra.gmra.mrb[0].mxu1 %v155_v35 }
 0x1ea   :  { %v261_v37 = vpop.f32.mrb[0].mxu1 }
 0x1eb   :  { %v262_v38 = vadd.f32 %v322_v36, %v261_v37  ;;  %v387_v39 = vpop.f32.mrb[1].mxu1 }
 0x1ec   :  { %v264_v40 = vpop.f32.mrb[2].mxu1 }
 0x1ed   :  { %300 = vst [vmem:[%s513_s5] sm:$0xff] %v262_v38  ;;  %v388_v41 = vpop.f32.mrb[3].mxu1 }

</bundles_post_ra>
